<compile_context>
chip_gen: v6e
topology: v6e:2x2x1
jax: 0.10.0
libtpu: 0.0.40
codegen_flags: <defaults>
</compile_context>

<pallas_src>
import functools

import jax
import jax.numpy as jnp
from jax.experimental import pallas as pl
from jax.experimental.pallas import tpu as pltpu


_TN = 256          # max N tile for lane-aligned (multiple-of-128) outputs
_TK = 2048         # max single-block K (this decoder's 1x1 convs have K <= 128)


def _round_up(x, m):
    return (x + m - 1) // m * m


def _pow2_floor(n):
    return 1 << (max(int(n), 1).bit_length() - 1)


@functools.lru_cache(maxsize=None)
def _vmem_limit_bytes():
    # 96 MiB of scoped VMEM on 128-MiB parts (v5e/v6e); half of physical on
    # v7x (64 MiB -> 32 MiB).  Conservative fallback if the query fails.
    try:
        cap = int(pltpu.get_tpu_info().vmem_capacity_bytes)
    except Exception:
        cap = 64 * 1024 * 1024
    if cap >= 128 * 1024 * 1024:
        return 96 * 1024 * 1024
    return max(32 * 1024 * 1024, cap // 2)


def _pick_row_tile(M, row_bytes, target_bytes=4 << 20):
    """Row (M) tile: as large as a ~4 MiB block allows (cap 2048 rows),
    power-of-two, preferring an exact divisor of M so no pad copy is needed."""
    target = _pow2_floor(max(256, min(2048, target_bytes // max(row_bytes, 1))))
    if M <= target:
        return M, M                      # one full-dim block (always legal)
    t = min(M & -M, target)              # largest pow2 divisor of M <= target
    if t >= 8:
        return t, M
    return target, _round_up(M, target)  # rare: odd row count -> pad M up


def _plane_row_tile(rows, row_bytes, target_bytes=2 << 20):
    """Row tile inside one (H*W, C) plane for the GroupNorm apply pass."""
    target = _pow2_floor(max(8, min(8192, target_bytes // max(row_bytes, 1))))
    if rows <= target:
        return rows
    t = min(rows & -rows, target)
    return t if t >= 8 else rows


# ----------------------------- bias matmuls ---------------------------------

def _matmul_bias_kernel(x_ref, w_ref, b_ref, o_ref):
    y = jnp.dot(x_ref[...], w_ref[...], preferred_element_type=jnp.float32)
    o_ref[...] = (y + b_ref[...]).astype(o_ref.dtype)


def matmul_bias(x, w, b, out_dtype=jnp.bfloat16):
    """(M,K) @ (K,N) + (1,N).  K is a single full-dim block (no zero padding),
    N is either tiled in 128-lane multiples or passed as one full-dim block
    when narrow (16/32/64/3), and the M tile adapts to a VMEM byte budget."""
    M, K = x.shape
    K2, N = w.shape
    assert K == K2 and K <= _TK, (K, _TK)
    xb = x.astype(jnp.bfloat16)
    wb = w.astype(jnp.bfloat16)
    bb = b.astype(jnp.float32).reshape(1, N)
    tn = min(_TN, N) if N % 128 == 0 else N
    tm, Mp = _pick_row_tile(M, row_bytes=2 * max(K, tn, 128))
    if Mp != M:
        xb = jnp.pad(xb, ((0, Mp - M), (0, 0)))
    out = pl.pallas_call(
        _matmul_bias_kernel,
        out_shape=jax.ShapeDtypeStruct((Mp, N), out_dtype),
        grid=(Mp // tm, N // tn),
        in_specs=[pl.BlockSpec((tm, K), lambda i, j: (i, 0)),
                  pl.BlockSpec((K, tn), lambda i, j: (0, j)),
                  pl.BlockSpec((1, tn), lambda i, j: (0, j))],
        out_specs=pl.BlockSpec((tm, tn), lambda i, j: (i, j)),
        compiler_params=pltpu.CompilerParams(
            dimension_semantics=("parallel", "parallel"),
            vmem_limit_bytes=_vmem_limit_bytes()),
    )(xb, wb, bb)
    return out if Mp == M else out[:M]


def _dual_matmul_bias_kernel(a_ref, wa_ref, c_ref, wc_ref, b_ref, o_ref):
    y = jnp.dot(a_ref[...], wa_ref[...], preferred_element_type=jnp.float32)
    y = y + jnp.dot(c_ref[...], wc_ref[...], preferred_element_type=jnp.float32)
    o_ref[...] = (y + b_ref[...]).astype(o_ref.dtype)


def dual_matmul_bias(a, wa, c, wc, b, out_dtype=jnp.bfloat16):
    """out = a @ wa + c @ wc + b  (replaces concat([a, c], ch) @ W).  No K/N
    zero padding; adaptive M tile."""
    M, Ka = a.shape
    Mc, Kc = c.shape
    assert M == Mc
    N = wa.shape[1]
    ab, cb = a.astype(jnp.bfloat16), c.astype(jnp.bfloat16)
    wab, wcb = wa.astype(jnp.bfloat16), wc.astype(jnp.bfloat16)
    bb = b.astype(jnp.float32).reshape(1, N)
    tn = min(_TN, N) if N % 128 == 0 else N
    row_bytes = 2 * (max(Ka, 128) + max(Kc, 128) + max(tn, 128))
    tm, Mp = _pick_row_tile(M, row_bytes=row_bytes)
    if Mp != M:
        ab = jnp.pad(ab, ((0, Mp - M), (0, 0)))
        cb = jnp.pad(cb, ((0, Mp - M), (0, 0)))
    out = pl.pallas_call(
        _dual_matmul_bias_kernel,
        out_shape=jax.ShapeDtypeStruct((Mp, N), out_dtype),
        grid=(Mp // tm, N // tn),
        in_specs=[pl.BlockSpec((tm, Ka), lambda i, j: (i, 0)),
                  pl.BlockSpec((Ka, tn), lambda i, j: (0, j)),
                  pl.BlockSpec((tm, Kc), lambda i, j: (i, 0)),
                  pl.BlockSpec((Kc, tn), lambda i, j: (0, j)),
                  pl.BlockSpec((1, tn), lambda i, j: (0, j))],
        out_specs=pl.BlockSpec((tm, tn), lambda i, j: (i, j)),
        compiler_params=pltpu.CompilerParams(
            dimension_semantics=("parallel", "parallel"),
            vmem_limit_bytes=_vmem_limit_bytes()),
    )(ab, wab, cb, wcb, bb)
    return out if Mp == M else out[:M]


# ---------------- 3x3x3 conv with fused GroupNorm statistics ----------------

def _conv3_kernel(xp_ref, w_ref, b_ref, o_ref, s_ref, acc_ref, *, H, W):
    kd = pl.program_id(2)

    @pl.when(kd == 0)
    def _init():
        acc_ref[...] = jnp.zeros_like(acc_ref)

    C = xp_ref.shape[-1]
    # Build one (H*W, 9C) slab per padded plane and do a single K=9C matmul.
    cols = [xp_ref[0, 0, kh:kh + H, kw:kw + W, :].reshape(H * W, C)
            for kh in range(3) for kw in range(3)]
    slab = jnp.concatenate(cols, axis=-1)
    acc_ref[...] += jnp.dot(slab, w_ref[kd],
                            preferred_element_type=jnp.float32)

    @pl.when(kd == pl.num_programs(2) - 1)
    def _finalize():
        y = acc_ref[...] + b_ref[...]
        o_ref[0, 0] = y.astype(o_ref.dtype)
        # fused GroupNorm stats: per-plane channel sum / sum-of-squares (f32)
        s_ref[0, 0] = jnp.concatenate(
            [jnp.sum(y, axis=0, keepdims=True),
             jnp.sum(y * y, axis=0, keepdims=True)], axis=0)


def conv3x3x3(x, w, b):
    """Conv3d k=3, p=1, channels-last.  w: (3, 9*Cin, Cout) bf16, b: (1, Cout).
    Returns (y_bf16 (B,D,H,W,Cout), stats_f32 (B,2,Cout)) where stats are the
    per-(batch, channel) sum / sumsq over D*H*W (used by the fused GroupNorm).
    The weight block has a constant index_map, so it is fetched only once."""
    B, D, H, W, C = x.shape
    Cout = w.shape[-1]
    wb = w.astype(jnp.bfloat16)
    bb = b.astype(jnp.float32).reshape(1, Cout)
    xp = jnp.pad(x.astype(jnp.bfloat16),
                 ((0, 0), (1, 1), (1, 1), (1, 1), (0, 0)))
    # TODO(synk): at full TransBTS resolution (H=W=128, C=16) add an H*W row
    # tile (or roll-based tap shifts) so the per-plane working set stays under
    # v7x's 32 MiB scoped VMEM; a rolling 3-plane DMA window over D would also
    # cut the ~3x input re-read across the kd axis.
    y, s = pl.pallas_call(
        functools.partial(_conv3_kernel, H=H, W=W),
        out_shape=(jax.ShapeDtypeStruct((B, D, H * W, Cout), jnp.bfloat16),
                   jax.ShapeDtypeStruct((B, D, 2, Cout), jnp.float32)),
        grid=(B, D, 3),
        in_specs=[
            pl.BlockSpec((1, 1, H + 2, W + 2, C),
                         lambda bb_, d, kd: (bb_, d + kd, 0, 0, 0)),
            pl.BlockSpec((3, 9 * C, Cout), lambda bb_, d, kd: (0, 0, 0)),
            pl.BlockSpec((1, Cout), lambda bb_, d, kd: (0, 0)),
        ],
        out_specs=(pl.BlockSpec((1, 1, H * W, Cout),
                                lambda bb_, d, kd: (bb_, d, 0, 0)),
                   pl.BlockSpec((1, 1, 2, Cout),
                                lambda bb_, d, kd: (bb_, d, 0, 0))),
        scratch_shapes=[pltpu.VMEM((H * W, Cout), jnp.float32)],
        compiler_params=pltpu.CompilerParams(
            dimension_semantics=("parallel", "parallel", "arbitrary"),
            vmem_limit_bytes=_vmem_limit_bytes()),
    )(xp, wb, bb)
    stats = s.sum(axis=1)                    # (B, 2, Cout): tiny XLA reduction
    return y.reshape(B, D, H, W, Cout), stats


# --------------- single-pass GroupNorm apply (+res, +endconv) ---------------

def _gn_apply_kernel(x_ref, sc_ref, sh_ref, *rest, slope, has_res, has_proj,
                     act):
    idx = 0
    r_ref = None
    if has_res:
        r_ref = rest[idx]
        idx += 1
    pw_ref = pb_ref = None
    if has_proj:
        pw_ref, pb_ref = rest[idx], rest[idx + 1]
        idx += 2
    o_ref = rest[idx]

    x = x_ref[0, 0].astype(jnp.float32)                    # (rows, C)
    y = x * sc_ref[...] + sh_ref[...]
    y = jnp.where(y >= 0.0, y, slope * y)                  # LeakyReLU
    if r_ref is not None:
        y = y + r_ref[0, 0].astype(jnp.float32)
    if pw_ref is not None:                                  # fused endconv
        y = jnp.dot(y.astype(jnp.bfloat16), pw_ref[...],
                    preferred_element_type=jnp.float32) + pb_ref[...]
        if act == "tanh":
            y = jnp.tanh(y)
    o_ref[0, 0] = y.astype(o_ref.dtype)


def group_norm_lrelu(x, stats, gamma, beta, residual=None, proj=None,
                     groups=8, eps=1e-5, slope=0.01):
    """GroupNorm(groups) + LeakyReLU (+ optional residual, + optional fused
    1x1x1 projection / Tanh).  `stats` are the (B, 2, C) sum/sumsq produced by
    conv3x3x3, so this is a single streamed apply pass over the activation."""
    B, D, H, W, C = x.shape
    HW = H * W
    cg = C // groups
    count = float(D * HW * cg)

    s = stats[:, 0, :].reshape(B, groups, cg).sum(-1)       # (B, G)
    ss = stats[:, 1, :].reshape(B, groups, cg).sum(-1)
    mean = s / count
    # TODO(synk): E[x^2]-E[x]^2 in f32 can cancel for large-mean activations;
    # switch to a shifted accumulation if that ever becomes an issue.
    var = jnp.maximum(ss / count - mean * mean, 0.0)
    inv = jax.lax.rsqrt(var + eps)
    inv_c = jnp.repeat(inv, cg, axis=1)                      # (B, C)
    mean_c = jnp.repeat(mean, cg, axis=1)
    scale = (inv_c * gamma.reshape(1, C)).astype(jnp.float32)
    shift = (beta.reshape(1, C) - mean_c * scale).astype(jnp.float32)

    rows = _plane_row_tile(HW, row_bytes=2 * max(C, 128))
    nt = HW // rows
    xf = x.reshape(B, D, HW, C)

    args = [xf, scale, shift]
    in_specs = [pl.BlockSpec((1, 1, rows, C), lambda b, d, t: (b, d, t, 0)),
                pl.BlockSpec((1, C), lambda b, d, t: (b, 0)),
                pl.BlockSpec((1, C), lambda b, d, t: (b, 0))]
    if residual is not None:
        args.append(residual.astype(jnp.bfloat16).reshape(B, D, HW, C))
        in_specs.append(
            pl.BlockSpec((1, 1, rows, C), lambda b, d, t: (b, d, t, 0)))
    if proj is not None:
        pw, pb, act = proj
        nout = pw.shape[1]
        args += [pw.astype(jnp.bfloat16),
                 pb.astype(jnp.float32).reshape(1, nout)]
        in_specs += [pl.BlockSpec((C, nout), lambda b, d, t: (0, 0)),
                     pl.BlockSpec((1, nout), lambda b, d, t: (0, 0))]
        out_c, out_dtype = nout, jnp.float32
    else:
        act = None
        out_c, out_dtype = C, jnp.bfloat16

    out = pl.pallas_call(
        functools.partial(_gn_apply_kernel, slope=slope,
                          has_res=residual is not None,
                          has_proj=proj is not None, act=act),
        out_shape=jax.ShapeDtypeStruct((B, D, HW, out_c), out_dtype),
        grid=(B, D, nt),
        in_specs=in_specs,
        out_specs=pl.BlockSpec((1, 1, rows, out_c),
                               lambda b, d, t: (b, d, t, 0)),
        compiler_params=pltpu.CompilerParams(
            dimension_semantics=("parallel", "parallel", "parallel"),
            vmem_limit_bytes=_vmem_limit_bytes()),
    )(*args)
    return out.reshape(B, D, H, W, out_c)


# ------------------------------ conv wrappers -------------------------------

def conv1x1x1(x, w, b):
    B, D, H, W, C = x.shape
    N = w.shape[1]
    y = matmul_bias(x.reshape(B * D * H * W, C), w, b)
    return y.reshape(B, D, H, W, N)


def deconv2x2x2_s2(x, w, b):
    """ConvTranspose3d k=2 s=2 (non-overlapping) as a matmul followed by a
    bf16 pixel-shuffle rearrangement in XLA."""
    B, D, H, W, C = x.shape
    Cout = w.shape[1] // 8
    y = matmul_bias(x.reshape(B * D * H * W, C), w, b)
    # TODO(synk): fold this 2x2x2 pixel-shuffle into the following dual matmul
    # (strided output index maps) so the shuffled tensor never hits HBM.
    y = y.reshape(B, D, H, W, 2, 2, 2, Cout)
    y = y.transpose(0, 1, 4, 2, 5, 3, 6, 7).reshape(B, 2 * D, 2 * H, 2 * W, Cout)
    return y


# --------------------------------- blocks -----------------------------------

def _conv_gn_block(p, x, residual=None, proj=None):
    y, s = conv3x3x3(x, p["c1"]["w"], p["c1"]["b"])
    y = group_norm_lrelu(y, s, p["gn1"]["g"], p["gn1"]["b"])
    y, s = conv3x3x3(y, p["c2"]["w"], p["c2"]["b"])
    return group_norm_lrelu(y, s, p["gn2"]["g"], p["gn2"]["b"],
                            residual=residual, proj=proj)


def en_block1(p, x):
    return _conv_gn_block(p, x)                  # no residual


def en_block2(p, x):
    return _conv_gn_block(p, x, residual=x)      # residual add after relu2


def de_block(p, x, proj=None):
    return _conv_gn_block(p, x, residual=x, proj=proj)


def de_up_cat(p, x, prev):
    x1 = conv1x1x1(x, p["c1"]["w"], p["c1"]["b"])
    y = deconv2x2x2_s2(x1, p["c2"]["w"], p["c2"]["b"])
    B, D2, H2, W2, Cout = y.shape
    M = B * D2 * H2 * W2
    # torch.cat((prev, y), ch) @ W3 == prev @ W3_top + y @ W3_bot (+ bias)
    out = dual_matmul_bias(prev.reshape(M, Cout), p["c3"]["w_prev"],
                           y.reshape(M, Cout), p["c3"]["w_up"], p["c3"]["b"])
    return out.reshape(B, D2, H2, W2, Cout)


# ----------------------------- decoder forward ------------------------------

def decoder_forward(params, x1_1, x2_1, x3_1, x, intmd_x,
                    intmd_layers=(1, 2, 3, 4), *, img_dim, patch_dim,
                    embedding_dim, task="seg"):
    assert intmd_layers is not None, "pass the intermediate layers for MLA"
    all_keys = list(reversed(["Z" + str(i) for i in intmd_layers]))
    i0 = int(all_keys[0][1:])
    x8 = intmd_x[str(2 * i0 - 1)]

    B = x8.shape[0]
    D0 = img_dim // (2 * patch_dim)
    H0 = W0 = img_dim // patch_dim
    # _reshape_output (kept channels-last instead of permuting to NCDHW)
    x8 = x8.reshape(B, D0, H0, W0, embedding_dim)

    x8 = en_block1(params["Enblock8_1"], x8)
    x8 = en_block2(params["Enblock8_2"], x8)

    # skip connections: NCDHW -> NDHWC, bf16
    p3 = jnp.transpose(x3_1, (0, 2, 3, 4, 1)).astype(jnp.bfloat16)
    p2 = jnp.transpose(x2_1, (0, 2, 3, 4, 1)).astype(jnp.bfloat16)
    p1 = jnp.transpose(x1_1, (0, 2, 3, 4, 1)).astype(jnp.bfloat16)

    y4 = de_up_cat(params["DeUp4"], x8, p3)
    y4 = de_block(params["DeBlock4"], y4)
    y3 = de_up_cat(params["DeUp3"], y4, p2)
    y3 = de_block(params["DeBlock3"], y3)
    y2 = de_up_cat(params["DeUp2"], y3, p1)

    act = None if task == "seg" else "tanh"      # Tanh only when task != 'seg'
    # endconv (1x1x1 -> outfeature) is fused into DeBlock2's final GN apply.
    y = de_block(params["DeBlock2"], y2,
                 proj=(params["endconv"]["w"], params["endconv"]["b"], act))
    return jnp.transpose(y, (0, 4, 1, 2, 3))     # back to NCDHW, f32


# ------------------------------- param init ---------------------------------

def init_decoder_params(key, embedding_dim=512, task="seg"):
    ed = embedding_dim
    keys = iter(jax.random.split(key, 64))

    def nrm(shape, scale=0.05):
        return scale * jax.random.normal(next(keys), shape, dtype=jnp.float32)

    def conv3(cin, cout):           # Conv3d(cin, cout, k=3): (kd, (kh*3+kw)*cin, cout)
        return {"w": nrm((3, 9 * cin, cout)).astype(jnp.bfloat16),
                "b": nrm((1, cout))}

    def conv1(cin, cout):           # Conv3d(cin, cout, k=1)
        return {"w": nrm((cin, cout)).astype(jnp.bfloat16), "b": nrm((1, cout))}

    def deconv(cin, cout):          # ConvTranspose3d(cin, cout, k=2, s=2)
        bias = nrm((cout,))
        return {"w": nrm((cin, 8 * cout)).astype(jnp.bfloat16),
                "b": jnp.tile(bias, 8)[None, :]}

    def gn(c):                      # GroupNorm affine params (default init)
        return {"g": jnp.ones((1, c), jnp.float32),
                "b": jnp.zeros((1, c), jnp.float32)}

    def conv_gn_block(cin, cout):
        return {"c1": conv3(cin, cout), "gn1": gn(cout),
                "c2": conv3(cout, cout), "gn2": gn(cout)}

    def deup(cin, cout):
        return {"c1": conv1(cin, cout), "c2": deconv(cout, cout),
                "c3": {"w_prev": nrm((cout, cout)).astype(jnp.bfloat16),
                       "w_up": nrm((cout, cout)).astype(jnp.bfloat16),
                       "b": nrm((1, cout))}}

    return {
        "Enblock8_1": conv_gn_block(ed, ed // 4),
        "Enblock8_2": conv_gn_block(ed // 4, ed // 4),
        "DeUp4": deup(ed // 4, ed // 8),
        "DeBlock4": conv_gn_block(ed // 8, ed // 8),
        "DeUp3": deup(ed // 8, ed // 16),
        "DeBlock3": conv_gn_block(ed // 16, ed // 16),
        "DeUp2": deup(ed // 16, ed // 32),
        "DeBlock2": conv_gn_block(ed // 32, ed // 32),
        "endconv": conv1(ed // 32, 3 if task == "seg" else 1),
    }


# ----------------------------------- main ------------------------------------

if __name__ == "__main__":
    # embedding_dim must be 512 so the hard-coded GroupNorm(8, 512//4) layers
    # match; keep spatial dims tiny instead (img_dim=16, patch_dim=8).
    B = 2
    img_dim, patch_dim, embedding_dim = 16, 8, 512
    task = "seg"
    D0 = img_dim // (2 * patch_dim)            # 1
    H0 = W0 = img_dim // patch_dim             # 2
    seq = D0 * H0 * W0                         # 4 transformer tokens

    root = jax.random.PRNGKey(0)
    kp, kx, k1, k2, k3, *kint = jax.random.split(root, 10)

    params = init_decoder_params(kp, embedding_dim, task)

    x = jax.random.normal(kx, (B, seq, embedding_dim), jnp.float32)
    intmd_x = {str(2 * i - 1): jax.random.normal(kint[i - 1],
                                                 (B, seq, embedding_dim),
                                                 jnp.float32)
               for i in (1, 2, 3, 4)}
    # skip connections in PyTorch NCDHW layout
    x3_1 = jax.random.normal(k3, (B, embedding_dim // 8, 2 * D0, 2 * H0, 2 * W0),
                             jnp.float32)
    x2_1 = jax.random.normal(k2, (B, embedding_dim // 16, 4 * D0, 4 * H0, 4 * W0),
                             jnp.float32)
    x1_1 = jax.random.normal(k1, (B, embedding_dim // 32, 8 * D0, 8 * H0, 8 * W0),
                             jnp.float32)

    y = decoder_forward(params, x1_1, x2_1, x3_1, x, intmd_x,
                        img_dim=img_dim, patch_dim=patch_dim,
                        embedding_dim=embedding_dim, task=task)
    y = jax.block_until_ready(y)
    assert y.shape == (B, 3, 8 * D0, 8 * H0, 8 * W0), y.shape
    assert bool(jnp.all(jnp.isfinite(y)))
    print("KERNEL_OK")
</pallas_src>

<mosaic_0001>
module attributes {stable_mosaic.version = 11 : i64} {
  func.func @_conv3_kernel(%arg0: i32, %arg1: i32, %arg2: i32, %arg3: memref<1x1x4x4x512xbf16, #tpu.memory_space<vmem>>, %arg4: memref<3x4608x128xbf16, #tpu.memory_space<vmem>>, %arg5: memref<1x128xf32, #tpu.memory_space<vmem>>, %arg6: memref<1x1x4x128xbf16, #tpu.memory_space<vmem>>, %arg7: memref<1x1x2x128xf32, #tpu.memory_space<vmem>>, %arg8: memref<4x128xf32, #tpu.memory_space<vmem>>) attributes {dimension_semantics = [#tpu.dimension_semantics<parallel>, #tpu.dimension_semantics<parallel>, #tpu.dimension_semantics<arbitrary>], iteration_bounds = array<i64: 2, 1, 3>, scalar_prefetch = 0 : i64, scratch_operands = 1 : i64, tpu.core_type = #tpu.core_type<tc>, window_params = [{transform_indices = @transform_0, window_bounds = array<i64: 1, 1, 4, 4, 512>}, {pipeline_mode = #tpu.pipeline_mode<synchronous>, transform_indices = @transform_1, window_bounds = array<i64: 3, 4608, 128>}, {pipeline_mode = #tpu.pipeline_mode<synchronous>, transform_indices = @transform_2, window_bounds = array<i64: 1, 128>}, {transform_indices = @transform_3, window_bounds = array<i64: 1, 1, 4, 128>}, {transform_indices = @transform_4, window_bounds = array<i64: 1, 1, 2, 128>}]} {
    %c0_i32 = arith.constant 0 : i32
    %0 = arith.cmpi eq, %arg2, %c0_i32 : i32
    %1 = arith.extui %0 : i1 to i32
    %c0_i32_0 = arith.constant 0 : i32
    %2 = arith.cmpi ne, %1, %c0_i32_0 : i32
    scf.if %2 {
      %cst_50 = arith.constant 0.000000e+00 : f32
      %41 = vector.broadcast %cst_50 : f32 to vector<4x128xf32>
      %c0_51 = arith.constant 0 : index
      %c0_52 = arith.constant 0 : index
      %42 = vector.load %arg8[%c0_51, %c0_52] : memref<4x128xf32, #tpu.memory_space<vmem>>, vector<4x128xf32>
      tpu.vector_store %arg8[%c0_51, %c0_52], %41 {strides = array<i32>} : memref<4x128xf32, #tpu.memory_space<vmem>>, vector<4x128xf32>,
    } else {
    }
    %c0 = arith.constant 0 : index
    %c0_1 = arith.constant 0 : index
    %c0_2 = arith.constant 0 : index
    %c0_3 = arith.constant 0 : index
    %c0_4 = arith.constant 0 : index
    %3 = vector.load %arg3[%c0, %c0_1, %c0_2, %c0_3, %c0_4] : memref<1x1x4x4x512xbf16, #tpu.memory_space<vmem>>, vector<1x1x2x2x512xbf16>
    %4 = vector.shape_cast %3 : vector<1x1x2x2x512xbf16> to vector<2x2x512xbf16>
    %5 = vector.shape_cast %4 : vector<2x2x512xbf16> to vector<4x512xbf16>
    %c0_5 = arith.constant 0 : index
    %c0_6 = arith.constant 0 : index
    %c0_7 = arith.constant 0 : index
    %c1 = arith.constant 1 : index
    %c0_8 = arith.constant 0 : index
    %6 = vector.load %arg3[%c0_5, %c0_6, %c0_7, %c1, %c0_8] : memref<1x1x4x4x512xbf16, #tpu.memory_space<vmem>>, vector<1x1x2x2x512xbf16>
    %7 = vector.shape_cast %6 : vector<1x1x2x2x512xbf16> to vector<2x2x512xbf16>
    %8 = vector.shape_cast %7 : vector<2x2x512xbf16> to vector<4x512xbf16>
    %c0_9 = arith.constant 0 : index
    %c0_10 = arith.constant 0 : index
    %c0_11 = arith.constant 0 : index
    %c2 = arith.constant 2 : index
    %c0_12 = arith.constant 0 : index
    %9 = vector.load %arg3[%c0_9, %c0_10, %c0_11, %c2, %c0_12] : memref<1x1x4x4x512xbf16, #tpu.memory_space<vmem>>, vector<1x1x2x2x512xbf16>
    %10 = vector.shape_cast %9 : vector<1x1x2x2x512xbf16> to vector<2x2x512xbf16>
    %11 = vector.shape_cast %10 : vector<2x2x512xbf16> to vector<4x512xbf16>
    %c0_13 = arith.constant 0 : index
    %c0_14 = arith.constant 0 : index
    %c1_15 = arith.constant 1 : index
    %c0_16 = arith.constant 0 : index
    %c0_17 = arith.constant 0 : index
    %12 = vector.load %arg3[%c0_13, %c0_14, %c1_15, %c0_16, %c0_17] : memref<1x1x4x4x512xbf16, #tpu.memory_space<vmem>>, vector<1x1x2x2x512xbf16>
    %13 = vector.shape_cast %12 : vector<1x1x2x2x512xbf16> to vector<2x2x512xbf16>
    %14 = vector.shape_cast %13 : vector<2x2x512xbf16> to vector<4x512xbf16>
    %c0_18 = arith.constant 0 : index
    %c0_19 = arith.constant 0 : index
    %c1_20 = arith.constant 1 : index
    %c1_21 = arith.constant 1 : index
    %c0_22 = arith.constant 0 : index
    %15 = vector.load %arg3[%c0_18, %c0_19, %c1_20, %c1_21, %c0_22] : memref<1x1x4x4x512xbf16, #tpu.memory_space<vmem>>, vector<1x1x2x2x512xbf16>
    %16 = vector.shape_cast %15 : vector<1x1x2x2x512xbf16> to vector<2x2x512xbf16>
    %17 = vector.shape_cast %16 : vector<2x2x512xbf16> to vector<4x512xbf16>
    %c0_23 = arith.constant 0 : index
    %c0_24 = arith.constant 0 : index
    %c1_25 = arith.constant 1 : index
    %c2_26 = arith.constant 2 : index
    %c0_27 = arith.constant 0 : index
    %18 = vector.load %arg3[%c0_23, %c0_24, %c1_25, %c2_26, %c0_27] : memref<1x1x4x4x512xbf16, #tpu.memory_space<vmem>>, vector<1x1x2x2x512xbf16>
    %19 = vector.shape_cast %18 : vector<1x1x2x2x512xbf16> to vector<2x2x512xbf16>
    %20 = vector.shape_cast %19 : vector<2x2x512xbf16> to vector<4x512xbf16>
    %c0_28 = arith.constant 0 : index
    %c0_29 = arith.constant 0 : index
    %c2_30 = arith.constant 2 : index
    %c0_31 = arith.constant 0 : index
    %c0_32 = arith.constant 0 : index
    %21 = vector.load %arg3[%c0_28, %c0_29, %c2_30, %c0_31, %c0_32] : memref<1x1x4x4x512xbf16, #tpu.memory_space<vmem>>, vector<1x1x2x2x512xbf16>
    %22 = vector.shape_cast %21 : vector<1x1x2x2x512xbf16> to vector<2x2x512xbf16>
    %23 = vector.shape_cast %22 : vector<2x2x512xbf16> to vector<4x512xbf16>
    %c0_33 = arith.constant 0 : index
    %c0_34 = arith.constant 0 : index
    %c2_35 = arith.constant 2 : index
    %c1_36 = arith.constant 1 : index
    %c0_37 = arith.constant 0 : index
    %24 = vector.load %arg3[%c0_33, %c0_34, %c2_35, %c1_36, %c0_37] : memref<1x1x4x4x512xbf16, #tpu.memory_space<vmem>>, vector<1x1x2x2x512xbf16>
    %25 = vector.shape_cast %24 : vector<1x1x2x2x512xbf16> to vector<2x2x512xbf16>
    %26 = vector.shape_cast %25 : vector<2x2x512xbf16> to vector<4x512xbf16>
    %c0_38 = arith.constant 0 : index
    %c0_39 = arith.constant 0 : index
    %c2_40 = arith.constant 2 : index
    %c2_41 = arith.constant 2 : index
    %c0_42 = arith.constant 0 : index
    %27 = vector.load %arg3[%c0_38, %c0_39, %c2_40, %c2_41, %c0_42] : memref<1x1x4x4x512xbf16, #tpu.memory_space<vmem>>, vector<1x1x2x2x512xbf16>
    %28 = vector.shape_cast %27 : vector<1x1x2x2x512xbf16> to vector<2x2x512xbf16>
    %29 = vector.shape_cast %28 : vector<2x2x512xbf16> to vector<4x512xbf16>
    %30 = tpu.concatenate %5, %8, %11, %14, %17, %20, %23, %26, %29 in 1 : vector<4x512xbf16>, vector<4x512xbf16>, vector<4x512xbf16>, vector<4x512xbf16>, vector<4x512xbf16>, vector<4x512xbf16>, vector<4x512xbf16>, vector<4x512xbf16>, vector<4x512xbf16> -> vector<4x4608xbf16>
    %c0_43 = arith.constant 0 : index
    %c0_44 = arith.constant 0 : index
    %31 = vector.load %arg8[%c0_43, %c0_44] : memref<4x128xf32, #tpu.memory_space<vmem>>, vector<4x128xf32>
    %32 = arith.index_cast %arg2 : i32 to index
    %c0_45 = arith.constant 0 : index
    %c0_46 = arith.constant 0 : index
    %33 = vector.load %arg4[%32, %c0_45, %c0_46] : memref<3x4608x128xbf16, #tpu.memory_space<vmem>>, vector<1x4608x128xbf16>
    %34 = vector.shape_cast %33 : vector<1x4608x128xbf16> to vector<4608x128xbf16>
    %cst = arith.constant dense<0.000000e+00> : vector<4x128xf32>
    %35 = tpu.matmul %30, %34, %cst {dimension_numbers = #tpu.dot_dimension_numbers<[1], [0], [0], [1], [0, 0, 1, 1], [], []>} : vector<4x4608xbf16>, vector<4608x128xbf16>, vector<4x128xf32> -> vector<4x128xf32>
    %36 = arith.addf %31, %35 : vector<4x128xf32>
    %c0_47 = arith.constant 0 : index
    %c0_48 = arith.constant 0 : index
    %37 = vector.load %arg8[%c0_47, %c0_48] : memref<4x128xf32, #tpu.memory_space<vmem>>, vector<4x128xf32>
    tpu.vector_store %arg8[%c0_47, %c0_48], %36 {strides = array<i32>} : memref<4x128xf32, #tpu.memory_space<vmem>>, vector<4x128xf32>,
    %c2_i32 = arith.constant 2 : i32
    %38 = arith.cmpi eq, %arg2, %c2_i32 : i32
    %39 = arith.extui %38 : i1 to i32
    %c0_i32_49 = arith.constant 0 : i32
    %40 = arith.cmpi ne, %39, %c0_i32_49 : i32
    scf.if %40 {
      %c0_50 = arith.constant 0 : index
      %c0_51 = arith.constant 0 : index
      %41 = vector.load %arg8[%c0_50, %c0_51] : memref<4x128xf32, #tpu.memory_space<vmem>>, vector<4x128xf32>
      %c0_52 = arith.constant 0 : index
      %c0_53 = arith.constant 0 : index
      %42 = vector.load %arg5[%c0_52, %c0_53] : memref<1x128xf32, #tpu.memory_space<vmem>>, vector<1x128xf32>
      %43 = vector.broadcast %42 : vector<1x128xf32> to vector<4x128xf32>
      %44 = arith.addf %41, %43 : vector<4x128xf32>
      %45 = arith.truncf %44 : vector<4x128xf32> to vector<4x128xbf16>
      %c0_54 = arith.constant 0 : index
      %c0_55 = arith.constant 0 : index
      %c0_56 = arith.constant 0 : index
      %c0_57 = arith.constant 0 : index
      %46 = vector.load %arg6[%c0_54, %c0_55, %c0_56, %c0_57] : memref<1x1x4x128xbf16, #tpu.memory_space<vmem>>, vector<1x1x4x128xbf16>
      %47 = vector.shape_cast %46 : vector<1x1x4x128xbf16> to vector<4x128xbf16>
      %48 = vector.shape_cast %45 : vector<4x128xbf16> to vector<1x1x4x128xbf16>
      tpu.vector_store %arg6[%c0_54, %c0_55, %c0_56, %c0_57], %48 {strides = array<i32>} : memref<1x1x4x128xbf16, #tpu.memory_space<vmem>>, vector<1x1x4x128xbf16>,
      %cst_58 = arith.constant dense<0.000000e+00> : vector<128xf32>
      %49 = vector.multi_reduction <add>, %44, %cst_58 [0] : vector<4x128xf32> to vector<128xf32>
      %50 = vector.shape_cast %49 : vector<128xf32> to vector<1x128xf32>
      %51 = arith.mulf %44, %44 : vector<4x128xf32>
      %cst_59 = arith.constant dense<0.000000e+00> : vector<128xf32>
      %52 = vector.multi_reduction <add>, %51, %cst_59 [0] : vector<4x128xf32> to vector<128xf32>
      %53 = vector.shape_cast %52 : vector<128xf32> to vector<1x128xf32>
      %54 = tpu.concatenate %50, %53 in 0 : vector<1x128xf32>, vector<1x128xf32> -> vector<2x128xf32>
      %c0_60 = arith.constant 0 : index
      %c0_61 = arith.constant 0 : index
      %c0_62 = arith.constant 0 : index
      %c0_63 = arith.constant 0 : index
      %55 = vector.load %arg7[%c0_60, %c0_61, %c0_62, %c0_63] : memref<1x1x2x128xf32, #tpu.memory_space<vmem>>, vector<1x1x2x128xf32>
      %56 = vector.shape_cast %55 : vector<1x1x2x128xf32> to vector<2x128xf32>
      %57 = vector.shape_cast %54 : vector<2x128xf32> to vector<1x1x2x128xf32>
      tpu.vector_store %arg7[%c0_60, %c0_61, %c0_62, %c0_63], %57 {strides = array<i32>} : memref<1x1x2x128xf32, #tpu.memory_space<vmem>>, vector<1x1x2x128xf32>,
    } else {
    }
    return
  }
  func.func @transform_0(%arg0: i32, %arg1: i32, %arg2: i32) -> (i32, i32, i32, i32, i32) {
    %0 = arith.addi %arg1, %arg2 : i32
    %c0_i32 = arith.constant 0 : i32
    %c0_i32_0 = arith.constant 0 : i32
    %c0_i32_1 = arith.constant 0 : i32
    %c0_i32_2 = arith.constant 0 : i32
    return %arg0, %0, %c0_i32, %c0_i32_0, %c0_i32_1 : i32, i32, i32, i32, i32
  }
  func.func @transform_1(%arg0: i32, %arg1: i32, %arg2: i32) -> (i32, i32, i32) {
    %c0_i32 = arith.constant 0 : i32
    %c0_i32_0 = arith.constant 0 : i32
    %c0_i32_1 = arith.constant 0 : i32
    %c0_i32_2 = arith.constant 0 : i32
    return %c0_i32, %c0_i32_0, %c0_i32_1 : i32, i32, i32
  }
  func.func @transform_2(%arg0: i32, %arg1: i32, %arg2: i32) -> (i32, i32) {
    %c0_i32 = arith.constant 0 : i32
    %c0_i32_0 = arith.constant 0 : i32
    %c0_i32_1 = arith.constant 0 : i32
    return %c0_i32, %c0_i32_0 : i32, i32
  }
  func.func @transform_3(%arg0: i32, %arg1: i32, %arg2: i32) -> (i32, i32, i32, i32) {
    %c0_i32 = arith.constant 0 : i32
    %c0_i32_0 = arith.constant 0 : i32
    %c0_i32_1 = arith.constant 0 : i32
    return %arg0, %arg1, %c0_i32, %c0_i32_0 : i32, i32, i32, i32
  }
  func.func @transform_4(%arg0: i32, %arg1: i32, %arg2: i32) -> (i32, i32, i32, i32) {
    %c0_i32 = arith.constant 0 : i32
    %c0_i32_0 = arith.constant 0 : i32
    %c0_i32_1 = arith.constant 0 : i32
    return %arg0, %arg1, %c0_i32, %c0_i32_0 : i32, i32, i32, i32
  }
}

</mosaic_0001>

<bundles_post_ra>
// kernel: tpu_custom_call.1
= control target key start
LH: loop header
LB: loop body
LE: loop exit
PB: predicated region body
PF: predicated region fallthrough
CT: control target
= control target key end

     0   :  { %s6112_s0 = inlined_call_operand.hbm [shape: bf16[2,3,4,4,512], index: 0, kind: input, shape index: {}]   ;;  %s6113_s1 = inlined_call_operand.hbm [shape: bf16[3,4608,128], index: 1, kind: input, shape index: {}]   ;;  %s6114_s2 = inlined_call_operand.hbm [shape: f32[1,128], index: 2, kind: input, shape index: {}]   ;;  %s6115_s3 = inlined_call_operand.hbm [shape: bf16[2,1,4,128], index: 3, kind: output, shape index: {0}]   ;;  %s6116_s4 = inlined_call_operand.hbm [shape: f32[2,1,2,128], index: 4, kind: output, shape index: {1}]  }
   0x1   :  { %6127 = sst [smem:[#allocation22_spill]] %s6113_s1 }
   0x2   :  { %6128 = sst [smem:[#allocation23_spill]] %s6114_s2 }
   0x3   :  { %6129 = sst [smem:[#allocation24_spill]] %s6115_s3 }
   0x4   :  { %6130 = sst [smem:[#allocation25_spill]] %s6116_s4 }
   0x5   :  { %10 = vsyncpa [#allocation4], 0 }
   0x6   :  { %12 = vsyncpa [#allocation4 + $0x1], 0 }
   0x7   :  { %13 = vsyncpa [#allocation7], 0 }
   0x8   :  { %14 = vsyncpa [#allocation5], 0 }
   0x9   :  { %16 = vsyncpa [#allocation5 + $0x1], 0 }
   0xa   :  { %17 = vsyncpa [#allocation11], 0 }
   0xb   :  { %19 = vsyncpa [#allocation11 + $0x1], 0  ;;  %s5483_s15 = smov 0   ;;  %s5485_s16 = smov 0  }
   0xc   :  { %s5487_s17 = smov 0   ;;  %s5489_s18 = smov 0  }
   0xd   :  { %s5491_s19 = smov 0   ;;  %s5493_s20 = smov 0  }
   0xe   :  { %s5495_s21 = smov 0   ;;  %s5497_s22 = smov 0  }
   0xf   :  { %s5499_s23 = smov 0   ;;  %s5501_s24 = smov 0  }
  0x10   :  { %s5503_s25 = smov 0  }
  0x11 LB: > { %6131 = sst [smem:[#allocation16_spill]] %s5405_s15  ;;  %s4038_s26 = sadd.s32 4294967295, %s5445_s25   ;;  %s5445_s25 = sphi %s5503_s25, %s25_s25   ;;  %s5441_s24 = sphi %s5501_s24, %s6167_s24   ;;  %s5437_s23 = sphi %s5499_s23, %s6159_s23   ;;  %s5433_s22 = sphi %s5497_s22, %s6166_s22   ;;  %s5429_s21 = sphi %s5495_s21, %s6158_s21   ;;  %s5425_s20 = sphi %s5493_s20, %s6165_s20   ;;  %s5421_s19 = sphi %s5491_s19, %s6164_s19   ;;  %s5417_s18 = sphi %s5489_s18, %s6163_s18   ;;  %s5413_s17 = sphi %s5487_s17, %s6162_s17   ;;  %s5409_s16 = sphi %s5485_s16, %s6161_s16   ;;  %s5405_s15 = sphi %s5483_s15, %s6160_s15  }
  0x12   : > { %6132 = sst [smem:[#allocation17_spill]] %s5433_s22  ;;  %s4039_s27 = sadd.s32 4294967294, %s5445_s25  }
  0x13   : > { %6133 = sst [smem:[#allocation18_spill]] %s5437_s23  ;;  %p68_p0 = scmp.ne.s32.totalorder %s5421_s19, %s5417_s18 }
  0x14   : > { %p5539_p1 = scmp.eq.s32.totalorder %s4038_s26, 0  ;;  %p135_p2 = scmp.ne.s32.totalorder %s5413_s17, %s5409_s16 }
  0x15   : > { %p136_p4 = scmp.eq.s32.totalorder %s4038_s26, 5  ;;  %p141_p5 = scmp.ne.s32.totalorder %s5409_s16, %s5405_s15 }
  0x16   : > { %p5548_p3 = por %p5539_p1, %p68_p0  ;;  %p142_p6 = scmp.eq.s32.totalorder %s4039_s27, 5 }
  0x17   : > { %p5554_p7 = por %p136_p4, %p135_p2  ;;  %p4040_p8 = scmp.ge.s32.totalorder %s5445_s25, 1 }
  0x18   : > { %p5559_p9 = por %p142_p6, %p141_p5  ;;  %p177_p10 = scmp.lt.s32.totalorder %s5445_s25, 7 }
  0x19   : > { %s6136_s5 = scalar_select %p5554_p7, 1, 0 }
  0x1a   : > { %s6138_s6 = scalar_select %p5559_p9, 1, 0 }
  0x1b   : > { %6137 = sst [smem:[#allocation19_spill]] %s6136_s5  ;;  %p5564_p11 = pnand %p4040_p8, %p177_p10 }
  0x1c   : > { %6139 = sst [smem:[#allocation20_spill]] %s6138_s6  ;;  %s5447_s8 = smov [#allocation6]  }
  0x1d   : > { %s189_s9 = sshll.u32 %s5447_s8, 4  ;;  %p4802_p12 = pneg %p5564_p11  ;;  %s190_s9 = int_to_ptr.vmem [resolvable:$true] %s189_s9 }
  0x1e   : > { %s5448_s11 = smov [#allocation8]   ;;  %s5222_s13 = scalar_lea.vmem %s190_s9, 110592 }
  0x1f   : > { %p5572_p13 = pnand %p4802_p12, %p5539_p1  ;;  %s203_s12 = sshll.u32 %s5448_s11, 4  ;;  %s204_s12 = int_to_ptr.vmem [resolvable:$true] %s203_s12 }
  0x20   : > { %p5223_p2 = scmp.ne.s32.totalorder %s190_s9, %s5222_s13  ;;  %p5230_p6 = scmp.lt.s32.totalorder %s190_s9, %s190_s9 }
  0x21   : > { %p5213_p0 = pneg %p5572_p13  ;;  %p5231_p8 = scmp.lt.s32.totalorder %s5222_s13, %s5222_s13 }
  0x23   : > { %p5225_p4 = pnand %p5223_p2, %p5213_p0  ;;  %p5232_p10 = por %p5231_p8, %p5230_p6 }
  0x25   : > { %p5226_p5 = pneg %p5225_p4 }
  0x27   : > { %p5233_p12 = pnand %p5232_p10, %p5226_p5 }
  0x29   : > { %5236 = shalt.err (!%p5233_p12)
}
  0x2a   : > { %s5449_s14 = smov 64   ;;  %s5450_s18 = smov 4  }
  0x2b   : > { %s6142_s1 = sld [smem:[#allocation22_spill]]  ;;  %s5248_s8 = scalar_lea.vmem %s204_s12, 16 }
  0x2c   : > { %p5249_p9 = scmp.ne.s32.totalorder %s204_s12, %s5248_s8  ;;  %s5255_s11 = scalar_lea.vmem %s204_s12, 32 }
  0x2d   : > { %p5256_p7 = scmp.lt.s32.totalorder %s204_s12, %s204_s12  ;;  %p5257_p6 = scmp.lt.s32.totalorder %s5255_s11, %s5248_s8 }
  0x2e   : > { %p5251_p2 = pnand %p5249_p9, %p5213_p0 }
  0x2f   : > { %p5258_p5 = por %p5257_p6, %p5256_p7 }
  0x30   : > { %p5252_p4 = pneg %p5251_p2 }
  0x31   : > { %4805 = dma.hbm_to_vmem [thread:$0]  (!%p5572_p13), %s6142_s1, 110592, %s190_s9, [#allocation7], %s5449_s14, %s5449_s14, %s5450_s18  }
  0x32   : > { %p5259_p8 = pnand %p5258_p5, %p5252_p4 }
  0x34   : > { %5262 = shalt.err (!%p5259_p8)
}
  0x35   : > { %s6143_s2 = sld [smem:[#allocation23_spill]]  ;;  %s37_s9 = sadd.s32 1, %s5437_s23 }
  0x36   : > { %s44_s14 = sadd.s32 1, %s5441_s24  ;;  %p38_p7 = scmp.ge.s32.totalorder %s37_s9, 3 }
  0x37   : > { %s55_s10 = sadd.s32 1, %s5425_s20  ;;  %p62_p9 = scmp.ne.s32.totalorder %s5425_s20, %s5421_s19 }
  0x38   : > { %p63_p0 = scmp.eq.s32.totalorder %s5445_s25, 0  ;;  %s6169_s9 = smov (%p38_p7, %s37_s9), 0 }
  0x39   : > { %6144 = sst [smem:[#allocation21_spill]] %s6169_s9  ;;  %s6171_s14 = smov (!%p38_p7, %s44_s14), %s5441_s24 }
  0x3a   : > { %s51_s29 = ssub.s32 %s5437_s23, %s6169_s9  ;;  %p5605_p10 = por %p63_p0, %p62_p9 }
  0x3b   : > { %4808 = dma.hbm_to_vmem [thread:$0]  (!%p5572_p13), %s6143_s2, 16, %s204_s12, [#allocation7]  }
  0x3c   : > { %p46_p13 = scmp.ge.s32.totalorder %s6171_s14, 2  ;;  %p4822_p12 = scmp.lt.s32.totalorder %s5445_s25, 6 }
  0x3d   : > { %s214_s12 = sand.u32 1, %s5425_s20   ;;  %s4045_s26 = sshll.u32 %s5437_s23, 4 }
  0x3e   : > { %s6173_s14 = smov (%p46_p13, %s6171_s14), 0  ;;  %s4044_s27 = sshll.u32 %s214_s12, 5 }
  0x3f   : > { %s50_s8 = ssub.s32 %s5441_s24, %s6173_s14  ;;  %s4787_s13 = smul.u32 48, %s5441_s24 }
  0x40   : > { %s52_s11 = sor.u32 %s51_s29, %s50_s8  ;;  %p123_p2 = scmp.eq.s32.totalorder %s50_s8, 0 }
  0x41   : > { %p53_p4 = scmp.eq.s32.totalorder %s52_s11, 0  ;;  %s6146_s1 = sadd.s32 1, %s5413_s17 }
  0x42   : > { %s5620_s2 = scalar_select %p123_p2, %s5413_s17, %s6146_s1  }
  0x43   : > { %s5623_s9 = scalar_select %p53_p4, %s5425_s20, %s55_s10  }
  0x44   : > { %s225_s6 = sadd.s32 %s4787_s13, %s4045_s26  ;;  %s218_s15 = scalar_lea.vmem [#allocation3], %s4044_s27 }
  0x45   : > { %s228_s4 = sshll.u32 %s218_s15, 4  ;;  %s4046_s23 = sshll.u32 %s225_s6, 5  ;;  %s229_s4 = int_to_ptr.vmem [resolvable:$true] %s228_s4 }
  0x46   : > { %s227_s22 = scalar_lea.hbm %s6112_s0, %s4046_s23  ;;  %p5632_p6 = pnand %p4822_p12, %p5605_p10 }
  0x47   : > { %s215_s1 = scalar_lea.sflag [#allocation4], %s214_s12  ;;  %s5276_s10 = scalar_lea.vmem %s229_s4, 512 }
  0x48   : > { %p5265_p5 = pneg %p5632_p6  ;;  %p5277_p8 = scmp.ne.s32.totalorder %s229_s4, %s5276_s10 }
  0x49   : > { %s5451_s15 = smov [#allocation3]  }
  0x4a   : > { %p5279_p7 = pnand %p5277_p8, %p5265_p5  ;;  %s5281_s6 = sshll.u32 %s5451_s15, 4  ;;  %s5282_s6 = int_to_ptr.vmem [resolvable:$false] %s5281_s6 }
  0x4b   : > { %s5283_s26 = scalar_lea.vmem %s5282_s6, 1024  ;;  %p5284_p0 = scmp.lt.s32.totalorder %s229_s4, %s5282_s6 }
  0x4c   : > { %p5280_p9 = pneg %p5279_p7  ;;  %p5285_p13 = scmp.lt.s32.totalorder %s5283_s26, %s5276_s10 }
  0x4e   : > { %p5286_p2 = por %p5285_p13, %p5284_p0 }
  0x50   : > { %p5287_p4 = pnand %p5286_p2, %p5280_p9 }
  0x52   : > { %5290 = shalt.err (!%p5287_p4)
}
  0x53   : > { %s5452_s3 = smov 128   ;;  %s5453_s23 = smov 8  }
  0x54   : > { %4812 = dma.hbm_to_vmem [thread:$0]  (!%p5632_p6), %s227_s22, 512, %s229_s4, %s215_s1, %s5452_s3, %s5452_s3, %s5453_s23  }
  0x55   : > { %240 = sbr.rel (%p5564_p11) target bundleno = 676 (0x2a4), region = 32  ;;  %s242_s5 = sand.u32 (!%p5564_p11), 1, %s5421_s19  }
  0x56   : > { %s4048_s18 = sshll.u32 (!%p5564_p11), %s242_s5, 5  ;;  %s243_s12 = scalar_lea.sflag (!%p5564_p11), [#allocation4], %s242_s5 }
  0x57   : > { %s5643_s27 = scalar_lea.vmem (!%p5564_p11), [#allocation3], %s4048_s18 }
  0x5a   : > { %5388 = dma.done.wait (%p5548_p3), %s243_s12, 512  }
  0x5b   : > { %5390 = vsyncadd (%p5548_p3), %s243_s12, 4294966784 }
  0x5c   : > { %5392 = dma.done.wait (%p5539_p1), [#allocation7], 110608  }
  0x5d   : > { %5394 = vsyncadd (%p5539_p1), [#allocation7], 4294856688  ;;  %s5654_s4 = sand.u32 1, %s5409_s16   ;;  %p4053_p11 = scmp.ne.s32.totalorder %s5429_s21, 0 }
  0x5e   : > { %s4051_s22 = sshll.u32 %s5654_s4, 1 }
  0x5f   : > { %s5657_s7 = scalar_lea.vmem [#allocation9], %s4051_s22  ;;  %s5659_s8 = scalar_lea.vmem [#allocation10], %s4051_s22 }
  0x60   : > { %289 = sbr.rel (%p4053_p11) target bundleno = 103 (0x67), region = 48 }
  0x65   : > { %v5454_v0 = vmov 0.0  }
  0x66   : > { %290 = vst [vmem:[#allocation2] sm:$0xf] %v5454_v0 }
  0x67 PF: > { %s4390_s28 = smul.u32 2304, %s5429_s21  ;;  %v4054_v1 = vld.sshfl [vmem:[%s5643_s27] sm:$0xf pattern:$0x75316420]  ;;  %v540_v2 = vlaneseq  ;;  %p4382_p1 = scmp.ne.s32.totalorder %s5429_s21, 2 }
  0x68   : > { %v4055_v3 = vld.sshfl [vmem:[%s5643_s27 + $0x8] sm:$0xf pattern:$0x75316420]  ;;  %v5455_v4 = vmov 1966171168  }
  0x69   : > { %v538_v5 = vunpack.c.l.s4 %v5455_v4  ;;  %v541_v6 = vshrl.u32 %v540_v2, 7  ;;  %s5665_s30 = scalar_lea.vmem [#allocation6], %s4390_s28  ;;  %v536_v9 = vcombine.low %v4054_v1, %v4055_v3  ;;  %vm329_vm0 = vsmask.f32 256 }
  0x6a   : > { %v4922_v7 = vld [vmem:[%s5665_s30 + $0x78] sm:$0xff]   ;;  %v4926_v14 = vld [vmem:[%s5665_s30 + $0x70] sm:$0xff]   ;;  %v4930_v20 = vld [vmem:[%s5665_s30 + $0x68] sm:$0xff]   ;;  %vm330_vm1 = vsmask.f32 1284 }
  0x6b   : > { %v4923_v8 = vld [vmem:[%s5665_s30 + $0xf8] sm:$0xff]   ;;  %v539_v10 = vunpack.c.0.s8 %v538_v5  ;;  %4391 = vmatprep.subr.bf16.mxu0 %v4922_v7  ;;  %v4927_v15 = vld [vmem:[%s5665_s30 + $0xf0] sm:$0xff]   ;;  %v4931_v21 = vld [vmem:[%s5665_s30 + $0xe8] sm:$0xff]   ;;  %vm332_vm2 = vsmask.f32 2312 }
  0x6c   : > { %v4924_v11 = vld [vmem:[%s5665_s30 + $0x38] sm:$0xff]   ;;  %4413 = vmatprep.subr.bf16.mxu1 %v4923_v8  ;;  %v4928_v17 = vld [vmem:[%s5665_s30 + $0x30] sm:$0xff]   ;;  %v4932_v23 = vld [vmem:[%s5665_s30 + $0x28] sm:$0xff]   ;;  %vm334_vm3 = vsmask.f32 3340 }
  0x6d   : > { %v4925_v12 = vld [vmem:[%s5665_s30 + $0xb8] sm:$0xff]   ;;  %v5671_v13 = vsub.s32 %v539_v10, %v541_v6  ;;  %4392 = vmatpush3.bf16.msra.mxu0 %v4924_v11  ;;  %v4929_v18 = vld [vmem:[%s5665_s30 + $0xb0] sm:$0xff]   ;;  %v4933_v24 = vld [vmem:[%s5665_s30 + $0xa8] sm:$0xff]   ;;  %vm336_vm5 = vsmask.f32 4368 }
  0x6e   : > { %4414 = vmatpush3.bf16.msra.mxu1 %v4925_v12  ;;  %4393 = vmatprep.subr.bf16.mxu0 %v4926_v14  ;;  %v4934_v26 = vld [vmem:[%s5665_s30 + $0x60] sm:$0xff]   ;;  %v4938_v30 = vld [vmem:[%s5665_s30 + $0x58] sm:$0xff]   ;;  %v4942_v34 = vld [vmem:[%s5665_s30 + $0x50] sm:$0xff]   ;;  %vm338_vm7 = vsmask.f32 5396 }
  0x6f   : > { %v543_v16 = vrot.slane %v536_v9, %v5671_v13  ;;  %4415 = vmatprep.subr.bf16.mxu1 %v4927_v15  ;;  %v4935_v27 = vld [vmem:[%s5665_s30 + $0xe0] sm:$0xff]   ;;  %v4939_v31 = vld [vmem:[%s5665_s30 + $0xd8] sm:$0xff]   ;;  %v4943_v35 = vld [vmem:[%s5665_s30 + $0xd0] sm:$0xff]   ;;  %vm340_vm8 = vsmask.f32 6424 }
  0x70   : > { %v4936_v28 = vld [vmem:[%s5665_s30 + $0x20] sm:$0xff]   ;;  %v4940_v32 = vld [vmem:[%s5665_s30 + $0x18] sm:$0xff]   ;;  %v4944_v36 = vld [vmem:[%s5665_s30 + $0x10] sm:$0xff]   ;;  %vm342_vm10 = vsmask.f32 7452 }
  0x71   : > { %v544_v19 = vcombine.high %v543_v16, %v543_v16  ;;  %4394 = vmatpush3.bf16.msra.mxu0 %v4928_v17  ;;  %v4937_v29 = vld [vmem:[%s5665_s30 + $0xa0] sm:$0xff]   ;;  %v4941_v33 = vld [vmem:[%s5665_s30 + $0x98] sm:$0xff]   ;;  %v4945_v37 = vld [vmem:[%s5665_s30 + $0x90] sm:$0xff]   ;;  %v551_v43 = vrot.slane %v543_v16, %v5671_v13 }
  0x72   : > { %4416 = vmatpush3.bf16.msra.mxu1 %v4929_v18  ;;  %4395 = vmatprep.subr.bf16.mxu0 %v4930_v20  ;;  %v4946_v38 = vld [vmem:[%s5665_s30 + $0x48] sm:$0xff]   ;;  %v4950_v42 = vld [vmem:[%s5665_s30 + $0x40] sm:$0xff]   ;;  %v4954_v48 = vld [vmem:[%s5665_s30 + $0x178] sm:$0xff]  }
  0x73   : > { %v558_v22 = vrot.slane %v544_v19, %v5671_v13  ;;  %4417 = vmatprep.subr.bf16.mxu1 %v4931_v21  ;;  %v4947_v39 = vld [vmem:[%s5665_s30 + $0xc8] sm:$0xff]   ;;  %v4951_v44 = vld [vmem:[%s5665_s30 + $0xc0] sm:$0xff]   ;;  %v559_v47 = vcombine.high %v551_v43, %v551_v43  ;;  %v4955_v49 = vld [vmem:[%s5665_s30 + $0x1f8] sm:$0xff]  }
  0x74   : > { %v4948_v40 = vld [vmem:[%s5665_s30 + $0x8] sm:$0xff]   ;;  %v4952_v45 = vld [vmem:[%s5665_s30] sm:$0xff]   ;;  %v4956_v50 = vld [vmem:[%s5665_s30 + $0x138] sm:$0xff]  }
  0x75   : > { %3137 = vmatprep.mubr.bf16.mxu0 %v558_v22  ;;  %v560_v25 = vcombine.high %v558_v22, %v558_v22  ;;  %4396 = vmatpush3.bf16.msra.mxu0 %v4932_v23  ;;  %v4949_v41 = vld [vmem:[%s5665_s30 + $0x88] sm:$0xff]   ;;  %v4953_v46 = vld [vmem:[%s5665_s30 + $0x80] sm:$0xff]   ;;  %v4957_v51 = vld [vmem:[%s5665_s30 + $0x1b8] sm:$0xff]  }
  0x76   : > { %4418 = vmatpush3.bf16.msra.mxu1 %v4933_v24  ;;  %4397 = vmatprep.subr.bf16.mxu0 %v4934_v26  ;;  %v4958_v52 = vld [vmem:[%s5665_s30 + $0x170] sm:$0xff]   ;;  %v4962_v56 = vld [vmem:[%s5665_s30 + $0x168] sm:$0xff]   ;;  %v4966_v60 = vld [vmem:[%s5665_s30 + $0x160] sm:$0xff]  }
  0x77   : > { %3177 = vmatprep.mubr.bf16.mxu1 %v560_v25  ;;  %4419 = vmatprep.subr.bf16.mxu1 %v4935_v27  ;;  %v4959_v53 = vld [vmem:[%s5665_s30 + $0x1f0] sm:$0xff]   ;;  %v4963_v57 = vld [vmem:[%s5665_s30 + $0x1e8] sm:$0xff]   ;;  %v4967_v61 = vld [vmem:[%s5665_s30 + $0x1e0] sm:$0xff]  }
  0x78   : > { %v4960_v54 = vld [vmem:[%s5665_s30 + $0x130] sm:$0xff]   ;;  %v4964_v58 = vld [vmem:[%s5665_s30 + $0x128] sm:$0xff]   ;;  %v4968_v62 = vld [vmem:[%s5665_s30 + $0x120] sm:$0xff]  }
  0x79   : > { %4398 = vmatpush3.bf16.msra.mxu0 %v4936_v28  ;;  %v4961_v55 = vld [vmem:[%s5665_s30 + $0x1b0] sm:$0xff]   ;;  %v4965_v59 = vld [vmem:[%s5665_s30 + $0x1a8] sm:$0xff]   ;;  %v4969_v63 = vld [vmem:[%s5665_s30 + $0x1a0] sm:$0xff]  }
  0x7a   : > { %4420 = vmatpush3.bf16.msra.mxu1 %v4937_v29  ;;  %4399 = vmatprep.subr.bf16.mxu0 %v4938_v30  ;;  %v4970_v0 = vld [vmem:[%s5665_s30 + $0x158] sm:$0xff]   ;;  %v4974_v4 = vld [vmem:[%s5665_s30 + $0x150] sm:$0xff]   ;;  %v4978_v8 = vld [vmem:[%s5665_s30 + $0x148] sm:$0xff]  }
  0x7b   : > { %4421 = vmatprep.subr.bf16.mxu1 %v4939_v31  ;;  %v4971_v1 = vld [vmem:[%s5665_s30 + $0x1d8] sm:$0xff]   ;;  %v4975_v5 = vld [vmem:[%s5665_s30 + $0x1d0] sm:$0xff]   ;;  %v4979_v9 = vld [vmem:[%s5665_s30 + $0x1c8] sm:$0xff]  }
  0x7c   : > { %v4972_v2 = vld [vmem:[%s5665_s30 + $0x118] sm:$0xff]   ;;  %v4976_v6 = vld [vmem:[%s5665_s30 + $0x110] sm:$0xff]   ;;  %v4980_v10 = vld [vmem:[%s5665_s30 + $0x108] sm:$0xff]  }
  0x7d   : > { %4400 = vmatpush3.bf16.msra.mxu0 %v4940_v32  ;;  %v4973_v3 = vld [vmem:[%s5665_s30 + $0x198] sm:$0xff]   ;;  %v4977_v7 = vld [vmem:[%s5665_s30 + $0x190] sm:$0xff]   ;;  %v4981_v11 = vld [vmem:[%s5665_s30 + $0x188] sm:$0xff]  }
  0x7e   : > { %4422 = vmatpush3.bf16.msra.mxu1 %v4941_v33  ;;  %4401 = vmatprep.subr.bf16.mxu0 %v4942_v34  ;;  %v4056_v12 = vld.sshfl [vmem:[%s5643_s27] sm:$0xff pattern:$0x75316420]  ;;  %v4057_v18 = vld.sshfl [vmem:[%s5643_s27 + $0x8] sm:$0xff pattern:$0x75316420]  ;;  %vm331_vm4 = vmor %vm329_vm0, %vm330_vm1 }
  0x7f   : > { %4423 = vmatprep.subr.bf16.mxu1 %v4943_v35  ;;  %v4982_v14 = vld [vmem:[%s5665_s30 + $0x140] sm:$0xff]   ;;  %v320_v19 = vcombine.high %v4056_v12, %v4056_v12  ;;  %v4986_v20 = vld [vmem:[%s5665_s30 + $0x278] sm:$0xff]   ;;  %v328_v21 = vcombine.high %v4057_v18, %v4057_v18  ;;  %v345_v22 = vshrl.u32 %v4056_v12, 16  ;;  %vm333_vm6 = vmor %vm331_vm4, %vm332_vm2  ;;  %v354_v24 = vshrl.u32 %v4057_v18, 16 }
  0x80   : > { %v4983_v15 = vld [vmem:[%s5665_s30 + $0x1c0] sm:$0xff]   ;;  %vm335_vm9 = vmor %vm333_vm6, %vm334_vm3  ;;  %v4987_v26 = vld [vmem:[%s5665_s30 + $0x2f8] sm:$0xff]  }
  0x81   : > { %4402 = vmatpush3.bf16.msra.mxu0 %v4944_v36  ;;  %v4984_v16 = vld [vmem:[%s5665_s30 + $0x100] sm:$0xff]   ;;  %vm337_vm11 = vmor %vm335_vm9, %vm336_vm5  ;;  %v350_v23 = vshll.u32 %v320_v19, 16  ;;  %v359_v25 = vshll.u32 %v328_v21, 16  ;;  %v4988_v34 = vld [vmem:[%s5665_s30 + $0x238] sm:$0xff]  }
  0x82   : > { %4424 = vmatpush3.bf16.msra.mxu1 %v4945_v37  ;;  %4403 = vmatprep.subr.bf16.mxu0 %v4946_v38  ;;  %v4985_v17 = vld [vmem:[%s5665_s30 + $0x180] sm:$0xff]   ;;  %vm339_vm12 = vmor %vm337_vm11, %vm338_vm7  ;;  %v4989_v36 = vld [vmem:[%s5665_s30 + $0x2b8] sm:$0xff]  }
  0x83   : > { %4425 = vmatprep.subr.bf16.mxu1 %v4947_v39  ;;  %vm341_vm13 = vmor %vm339_vm12, %vm340_vm8  ;;  %v4990_v38 = vld [vmem:[%s5665_s30 + $0x270] sm:$0xff]   ;;  %v5019_v12 = vld [vmem:[%s5665_s30 + $0x3f8] sm:$0xff]  }
  0x84   : > { %vm5740_vm14 = vmor %vm341_vm13, %vm342_vm10  ;;  %v5023_v18 = vld [vmem:[%s5665_s30 + $0x3f0] sm:$0xff]  }
  0x85   : > { %4404 = vmatpush3.bf16.msra.mxu0 %v4948_v40  ;;  %v352_v28 = vsel %vm5740_vm14, %v345_v22, %v350_v23  ;;  %v5748_v29 = vsel %vm5740_vm14, %v354_v24, %v359_v25  ;;  %v4991_v40 = vld [vmem:[%s5665_s30 + $0x2f0] sm:$0xff]   ;;  %v5027_v22 = vld [vmem:[%s5665_s30 + $0x3e8] sm:$0xff]   ;;  %v5030_v24 = vld [vmem:[%s5665_s30 + $0x360] sm:$0xff]  }
  0x86   : > { %4426 = vmatpush3.bf16.msra.mxu1 %v4949_v41  ;;  %4405 = vmatprep.subr.bf16.mxu0 %v4950_v42  ;;  %v565_v30 = vcombine.low %v352_v28, %v5748_v29  ;;  %v4992_v41 = vld [vmem:[%s5665_s30 + $0x230] sm:$0xff]   ;;  %v5028_v23 = vld [vmem:[%s5665_s30 + $0x328] sm:$0xff]   ;;  %v5032_v28 = vld [vmem:[%s5665_s30 + $0x320] sm:$0xff]  }
  0x87   : > { %4427 = vmatprep.subr.bf16.mxu1 %v4951_v44  ;;  %v4993_v42 = vld [vmem:[%s5665_s30 + $0x2b0] sm:$0xff]   ;;  %v4995_v44 = vld [vmem:[%s5665_s30 + $0x2e8] sm:$0xff]  }
  0x88   : > { %v572_v31 = vrot.slane %v565_v30, %v5671_v13  ;;  %v5024_v19 = vld [vmem:[%s5665_s30 + $0x330] sm:$0xff]   ;;  %v5029_v25 = vld [vmem:[%s5665_s30 + $0x3a8] sm:$0xff]   ;;  %v5034_v30 = vld [vmem:[%s5665_s30 + $0x358] sm:$0xff]  }
  0x89   : > { %4406 = vmatpush3.bf16.msra.mxu0 %v4952_v45  ;;  %v4996_v45 = vld [vmem:[%s5665_s30 + $0x228] sm:$0xff]   ;;  %v5025_v21 = vld [vmem:[%s5665_s30 + $0x3b0] sm:$0xff]  }
  0x8a   : > { %4428 = vmatpush3.bf16.msra.mxu1 %v4953_v46  ;;  %4435 = vmatprep.subr.bf16.mxu0 %v4954_v48  ;;  %v573_v32 = vcombine.high %v572_v31, %v572_v31  ;;  %v580_v33 = vrot.slane %v572_v31, %v5671_v13  ;;  %v4997_v46 = vld [vmem:[%s5665_s30 + $0x2a8] sm:$0xff]   ;;  %v4999_v48 = vld [vmem:[%s5665_s30 + $0x2e0] sm:$0xff]  }
  0x8b   : > { %4457 = vmatprep.subr.bf16.mxu1 %v4955_v49  ;;  %v5000_v49 = vld [vmem:[%s5665_s30 + $0x220] sm:$0xff]  }
  0x8c   : > { %3138 = vmatmul.mubr.bf16.vlgmr.msra.gmra.mxu0 %v551_v43  ;;  %v587_v35 = vrot.slane %v573_v32, %v5671_v13  ;;  %v588_v37 = vcombine.high %v580_v33, %v580_v33  ;;  %v4994_v43 = vld [vmem:[%s5665_s30 + $0x268] sm:$0xff]   ;;  %v5033_v31 = vld [vmem:[%s5665_s30 + $0x3a0] sm:$0xff]   ;;  %v5035_v32 = vld [vmem:[%s5665_s30 + $0x3d8] sm:$0xff]  }
  0x8d   : > { %3178 = vmatmul.mubr.bf16.vlgmr.msra.gmra.mxu1 %v559_v47  ;;  %4436 = vmatpush3.bf16.msra.mxu0 %v4956_v50  ;;  %v4998_v47 = vld [vmem:[%s5665_s30 + $0x260] sm:$0xff]  }
  0x8e   : > { %4458 = vmatpush3.bf16.msra.mxu1 %v4957_v51  ;;  %4437 = vmatprep.subr.bf16.mxu0 %v4958_v52  ;;  %v589_v39 = vcombine.high %v587_v35, %v587_v35  ;;  %v5001_v50 = vld [vmem:[%s5665_s30 + $0x2a0] sm:$0xff]   ;;  %v5002_v51 = vld [vmem:[%s5665_s30 + $0x258] sm:$0xff]  }
  0x8f   : > { %4459 = vmatprep.subr.bf16.mxu1 %v4959_v53  ;;  %3217 = vmatprep.mubr.bf16.mxu0 %v587_v35  ;;  %v5003_v52 = vld [vmem:[%s5665_s30 + $0x2d8] sm:$0xff]  }
  0x90   : > { %3257 = vmatprep.mubr.bf16.mxu1 %v589_v39  ;;  %v5004_v53 = vld [vmem:[%s5665_s30 + $0x218] sm:$0xff]   ;;  %v5041_v39 = vld [vmem:[%s5665_s30 + $0x390] sm:$0xff]  }
  0x91   : > { %4438 = vmatpush3.bf16.msra.mxu0 %v4960_v54  ;;  %v5005_v54 = vld [vmem:[%s5665_s30 + $0x298] sm:$0xff]  }
  0x92   : > { %4460 = vmatpush3.bf16.msra.mxu1 %v4961_v55  ;;  %4439 = vmatprep.subr.bf16.mxu0 %v4962_v56  ;;  %v5006_v55 = vld [vmem:[%s5665_s30 + $0x250] sm:$0xff]   ;;  %v5037_v35 = vld [vmem:[%s5665_s30 + $0x398] sm:$0xff]  }
  0x93   : > { %4461 = vmatprep.subr.bf16.mxu1 %v4963_v57  ;;  %v5007_v56 = vld [vmem:[%s5665_s30 + $0x2d0] sm:$0xff]  }
  0x94   : > { %v5008_v57 = vld [vmem:[%s5665_s30 + $0x210] sm:$0xff]  }
  0x95   : > { %4440 = vmatpush3.bf16.msra.mxu0 %v4964_v58  ;;  %v5009_v58 = vld [vmem:[%s5665_s30 + $0x290] sm:$0xff]  }
  0x96   : > { %4462 = vmatpush3.bf16.msra.mxu1 %v4965_v59  ;;  %4441 = vmatprep.subr.bf16.mxu0 %v4966_v60  ;;  %v5010_v59 = vld [vmem:[%s5665_s30 + $0x248] sm:$0xff]  }
  0x97   : > { %4463 = vmatprep.subr.bf16.mxu1 %v4967_v61  ;;  %v4060_v60 = vld.sshfl [vmem:[%s5643_s27] sm:$0xf0 pattern:$0x75316420] }
  0x98   : > { %v5779_v61 = vld.sshfl [vmem:[%s5643_s27 + $0x8] sm:$0xf0 pattern:$0x75316420] }
  0x99   : > { %4442 = vmatpush3.bf16.msra.mxu0 %v4968_v62  ;;  %v5011_v62 = vld [vmem:[%s5665_s30 + $0x2c8] sm:$0xff]  }
  0x9a   : > { %4464 = vmatpush3.bf16.msra.mxu1 %v4969_v63  ;;  %4443 = vmatprep.subr.bf16.mxu0 %v4970_v0  ;;  %v4090_v63 = vcombine.high %v4060_v60, %v5779_v61  ;;  %v5012_v0 = vld [vmem:[%s5665_s30 + $0x208] sm:$0xff]   ;;  %v5053_v60 = vld [vmem:[%s5665_s30 + $0x4b8] sm:$0xff]  }
  0x9b   : > { %4465 = vmatprep.subr.bf16.mxu1 %v4971_v1  ;;  %v5014_v1 = vld [vmem:[%s5665_s30 + $0x240] sm:$0xff]  }
  0x9d   : > { %4444 = vmatpush3.bf16.msra.mxu0 %v4972_v2  ;;  %v601_v2 = vrot.slane %v4090_v63, %v5671_v13  ;;  %v5056_v63 = vld [vmem:[%s5665_s30 + $0x430] sm:$0xff]  }
  0x9e   : > { %4466 = vmatpush3.bf16.msra.mxu1 %v4973_v3  ;;  %4445 = vmatprep.subr.bf16.mxu0 %v4974_v4  ;;  %v5013_v3 = vld [vmem:[%s5665_s30 + $0x288] sm:$0xff]   ;;  %v5015_v4 = vld [vmem:[%s5665_s30 + $0x2c0] sm:$0xff]  }
  0x9f   : > { %4467 = vmatprep.subr.bf16.mxu1 %v4975_v5  ;;  %v602_v5 = vcombine.high %v601_v2, %v601_v2 }
  0xa1   : > { %4446 = vmatpush3.bf16.msra.mxu0 %v4976_v6  ;;  %v5016_v6 = vld [vmem:[%s5665_s30 + $0x200] sm:$0xff]  }
  0xa2   : > { %4468 = vmatpush3.bf16.msra.mxu1 %v4977_v7  ;;  %4447 = vmatprep.subr.bf16.mxu0 %v4978_v8  ;;  %v616_v7 = vrot.slane %v602_v5, %v5671_v13  ;;  %v609_v8 = vrot.slane %v601_v2, %v5671_v13  ;;  %v5059_v2 = vld [vmem:[%s5665_s30 + $0x4e8] sm:$0xff]  }
  0xa3   : > { %4469 = vmatprep.subr.bf16.mxu1 %v4979_v9  ;;  %v5018_v9 = vld [vmem:[%s5665_s30 + $0x378] sm:$0xff]   ;;  %v5061_v5 = vld [vmem:[%s5665_s30 + $0x4a8] sm:$0xff]  }
  0xa5   : > { %4448 = vmatpush3.bf16.msra.mxu0 %v4980_v10  ;;  %v5017_v10 = vld [vmem:[%s5665_s30 + $0x280] sm:$0xff]  }
  0xa6   : > { %4470 = vmatpush3.bf16.msra.mxu1 %v4981_v11  ;;  %4449 = vmatprep.subr.bf16.mxu0 %v4982_v14  ;;  %v618_v11 = vcombine.high %v616_v7, %v616_v7  ;;  %v5020_v14 = vld [vmem:[%s5665_s30 + $0x338] sm:$0xff]  }
  0xa7   : > { %4471 = vmatprep.subr.bf16.mxu1 %v4983_v15  ;;  %v617_v15 = vcombine.high %v609_v8, %v609_v8 }
  0xa9   : > { %4450 = vmatpush3.bf16.msra.mxu0 %v4984_v16  ;;  %v5022_v16 = vld [vmem:[%s5665_s30 + $0x370] sm:$0xff]  }
  0xaa   : > { %4472 = vmatpush3.bf16.msra.mxu1 %v4985_v17  ;;  %4479 = vmatprep.subr.bf16.mxu0 %v4986_v20  ;;  %v5021_v17 = vld [vmem:[%s5665_s30 + $0x3b8] sm:$0xff]   ;;  %v5026_v20 = vld [vmem:[%s5665_s30 + $0x368] sm:$0xff]  }
  0xab   : > { %4501 = vmatprep.subr.bf16.mxu1 %v4987_v26  ;;  %v5031_v26 = vld [vmem:[%s5665_s30 + $0x3e0] sm:$0xff]  }
  0xac   : > { %3218 = vmatmul.mubr.bf16.vlgmr.msra.gmra.mxu0 %v580_v33  ;;  %v5036_v33 = vld [vmem:[%s5665_s30 + $0x318] sm:$0xff]  }
  0xad   : > { %4480 = vmatpush3.bf16.msra.mxu0 %v4988_v34  ;;  %3258 = vmatmul.mubr.bf16.vlgmr.msra.gmra.mxu1 %v588_v37  ;;  %v5038_v34 = vld [vmem:[%s5665_s30 + $0x350] sm:$0xff]  }
  0xae   : > { %4481 = vmatprep.subr.bf16.mxu0 %v4990_v38  ;;  %4502 = vmatpush3.bf16.msra.mxu1 %v4989_v36  ;;  %v5039_v36 = vld [vmem:[%s5665_s30 + $0x3d0] sm:$0xff]   ;;  %v5042_v38 = vld [vmem:[%s5665_s30 + $0x348] sm:$0xff]  }
  0xaf   : > { %4503 = vmatprep.subr.bf16.mxu1 %v4991_v40  ;;  %3297 = vmatprep.mubr.bf16.mxu0 %v616_v7  ;;  %v5040_v37 = vld [vmem:[%s5665_s30 + $0x310] sm:$0xff]   ;;  %v5043_v40 = vld [vmem:[%s5665_s30 + $0x3c8] sm:$0xff]   ;;  %v5064_v7 = vld [vmem:[%s5665_s30 + $0x420] sm:$0xff]  }
  0xb0   : > { %3337 = vmatprep.mubr.bf16.mxu1 %v618_v11  ;;  %v5068_v11 = vld [vmem:[%s5665_s30 + $0x418] sm:$0xff]  }
  0xb1   : > { %4482 = vmatpush3.bf16.msra.mxu0 %v4992_v41  ;;  %v5819_v41 = vld.sshfl [vmem:[%s5643_s27 + $0x10] sm:$0xf pattern:$0x75316420] }
  0xb2   : > { %4483 = vmatprep.subr.bf16.mxu0 %v4994_v43  ;;  %4504 = vmatpush3.bf16.msra.mxu1 %v4993_v42  ;;  %v5210_v42 = vld.sshfl [vmem:[%s5643_s27 + $0x8] sm:$0xf pattern:$0x75316420] }
  0xb3   : > { %4505 = vmatprep.subr.bf16.mxu1 %v4995_v44  ;;  %v623_v43 = vcombine.low %v5210_v42, %v5819_v41  ;;  %v5044_v44 = vld [vmem:[%s5665_s30 + $0x308] sm:$0xff]  }
  0xb5   : > { %4484 = vmatpush3.bf16.msra.mxu0 %v4996_v45  ;;  %v5046_v45 = vld [vmem:[%s5665_s30 + $0x340] sm:$0xff]  }
  0xb6   : > { %4485 = vmatprep.subr.bf16.mxu0 %v4998_v47  ;;  %4506 = vmatpush3.bf16.msra.mxu1 %v4997_v46  ;;  %v630_v46 = vrot.slane %v623_v43, %v5671_v13  ;;  %v5045_v47 = vld [vmem:[%s5665_s30 + $0x388] sm:$0xff]   ;;  %v5086_v43 = vld [vmem:[%s5665_s30 + $0x570] sm:$0xff]  }
  0xb7   : > { %4507 = vmatprep.subr.bf16.mxu1 %v4999_v48  ;;  %v5047_v48 = vld [vmem:[%s5665_s30 + $0x3c0] sm:$0xff]  }
  0xb9   : > { %4486 = vmatpush3.bf16.msra.mxu0 %v5000_v49  ;;  %v631_v49 = vcombine.high %v630_v46, %v630_v46 }
  0xba   : > { %4487 = vmatprep.subr.bf16.mxu0 %v5002_v51  ;;  %4508 = vmatpush3.bf16.msra.mxu1 %v5001_v50  ;;  %v5048_v50 = vld [vmem:[%s5665_s30 + $0x300] sm:$0xff]  }
  0xbb   : > { %4509 = vmatprep.subr.bf16.mxu1 %v5003_v52  ;;  %v645_v51 = vrot.slane %v631_v49, %v5671_v13  ;;  %v638_v52 = vrot.slane %v630_v46, %v5671_v13  ;;  %v5088_v46 = vld [vmem:[%s5665_s30 + $0x530] sm:$0xff]   ;;  %v5091_v49 = vld [vmem:[%s5665_s30 + $0x5e8] sm:$0xff]  }
  0xbd   : > { %4488 = vmatpush3.bf16.msra.mxu0 %v5004_v53  ;;  %v5050_v53 = vld [vmem:[%s5665_s30 + $0x478] sm:$0xff]  }
  0xbe   : > { %4489 = vmatprep.subr.bf16.mxu0 %v5006_v55  ;;  %4510 = vmatpush3.bf16.msra.mxu1 %v5005_v54  ;;  %v5049_v54 = vld [vmem:[%s5665_s30 + $0x380] sm:$0xff]   ;;  %v647_v55 = vcombine.high %v645_v51, %v645_v51 }
  0xbf   : > { %4511 = vmatprep.subr.bf16.mxu1 %v5007_v56  ;;  %v5051_v56 = vld [vmem:[%s5665_s30 + $0x4f8] sm:$0xff]  }
  0xc1   : > { %4490 = vmatpush3.bf16.msra.mxu0 %v5008_v57  ;;  %v5052_v57 = vld [vmem:[%s5665_s30 + $0x438] sm:$0xff]  }
  0xc2   : > { %4491 = vmatprep.subr.bf16.mxu0 %v5010_v59  ;;  %4512 = vmatpush3.bf16.msra.mxu1 %v5009_v58  ;;  %v646_v58 = vcombine.high %v638_v52, %v638_v52  ;;  %v5054_v59 = vld [vmem:[%s5665_s30 + $0x470] sm:$0xff]  }
  0xc3   : > { %4513 = vmatprep.subr.bf16.mxu1 %v5011_v62  ;;  %v5055_v62 = vld [vmem:[%s5665_s30 + $0x4f0] sm:$0xff]  }
  0xc5   : > { %4492 = vmatpush3.bf16.msra.mxu0 %v5012_v0  ;;  %v5058_v0 = vld [vmem:[%s5665_s30 + $0x468] sm:$0xff]  }
  0xc6   : > { %4493 = vmatprep.subr.bf16.mxu0 %v5014_v1  ;;  %4514 = vmatpush3.bf16.msra.mxu1 %v5013_v3  ;;  %v5057_v1 = vld [vmem:[%s5665_s30 + $0x4b0] sm:$0xff]   ;;  %v5060_v3 = vld [vmem:[%s5665_s30 + $0x428] sm:$0xff]  }
  0xc7   : > { %4515 = vmatprep.subr.bf16.mxu1 %v5015_v4  ;;  %v5062_v4 = vld [vmem:[%s5665_s30 + $0x460] sm:$0xff]  }
  0xc9   : > { %4494 = vmatpush3.bf16.msra.mxu0 %v5016_v6  ;;  %v5063_v6 = vld [vmem:[%s5665_s30 + $0x4e0] sm:$0xff]  }
  0xca   : > { %4523 = vmatprep.subr.bf16.mxu0 %v5018_v9  ;;  %4516 = vmatpush3.bf16.msra.mxu1 %v5017_v10  ;;  %v5065_v9 = vld [vmem:[%s5665_s30 + $0x4a0] sm:$0xff]   ;;  %v5067_v10 = vld [vmem:[%s5665_s30 + $0x4d8] sm:$0xff]  }
  0xcb   : > { %4545 = vmatprep.subr.bf16.mxu1 %v5019_v12  ;;  %v5070_v12 = vld [vmem:[%s5665_s30 + $0x450] sm:$0xff]  }
  0xcc   : > { %3298 = vmatmul.mubr.bf16.vlgmr.msra.gmra.mxu0 %v609_v8  ;;  %v5066_v8 = vld [vmem:[%s5665_s30 + $0x458] sm:$0xff]  }
  0xcd   : > { %4524 = vmatpush3.bf16.msra.mxu0 %v5020_v14  ;;  %3338 = vmatmul.mubr.bf16.vlgmr.msra.gmra.mxu1 %v617_v15  ;;  %v5069_v14 = vld [vmem:[%s5665_s30 + $0x498] sm:$0xff]   ;;  %v5071_v15 = vld [vmem:[%s5665_s30 + $0x4d0] sm:$0xff]  }
  0xce   : > { %4525 = vmatprep.subr.bf16.mxu0 %v5022_v16  ;;  %4546 = vmatpush3.bf16.msra.mxu1 %v5021_v17  ;;  %v5072_v16 = vld [vmem:[%s5665_s30 + $0x410] sm:$0xff]   ;;  %v5074_v17 = vld [vmem:[%s5665_s30 + $0x448] sm:$0xff]  }
  0xcf   : > { %4547 = vmatprep.subr.bf16.mxu1 %v5023_v18  ;;  %3377 = vmatprep.mubr.bf16.mxu0 %v645_v51  ;;  %v5073_v18 = vld [vmem:[%s5665_s30 + $0x490] sm:$0xff]   ;;  %v5093_v51 = vld [vmem:[%s5665_s30 + $0x5a8] sm:$0xff]  }
  0xd0   : > { %3417 = vmatprep.mubr.bf16.mxu1 %v647_v55  ;;  %v5097_v55 = vld [vmem:[%s5665_s30 + $0x5a0] sm:$0xff]  }
  0xd1   : > { %4526 = vmatpush3.bf16.msra.mxu0 %v5024_v19  ;;  %v4069_v19 = vld.sshfl [vmem:[%s5643_s27 + $0x10] sm:$0xff pattern:$0x75316420] }
  0xd2   : > { %4527 = vmatprep.subr.bf16.mxu0 %v5026_v20  ;;  %4548 = vmatpush3.bf16.msra.mxu1 %v5025_v21  ;;  %v5075_v20 = vld [vmem:[%s5665_s30 + $0x4c8] sm:$0xff]   ;;  %v420_v21 = vcombine.high %v4069_v19, %v4069_v19 }
  0xd3   : > { %4549 = vmatprep.subr.bf16.mxu1 %v5027_v22  ;;  %v431_v22 = vshrl.u32 %v4069_v19, 16  ;;  %v5117_v19 = vld [vmem:[%s5665_s30 + $0x6b8] sm:$0xff]  }
  0xd5   : > { %4528 = vmatpush3.bf16.msra.mxu0 %v5028_v23  ;;  %v5076_v23 = vld [vmem:[%s5665_s30 + $0x408] sm:$0xff]  }
  0xd6   : > { %4529 = vmatprep.subr.bf16.mxu0 %v5030_v24  ;;  %4550 = vmatpush3.bf16.msra.mxu1 %v5029_v25  ;;  %v5078_v24 = vld [vmem:[%s5665_s30 + $0x440] sm:$0xff]   ;;  %v436_v25 = vshll.u32 %v420_v21, 16  ;;  %v5118_v21 = vld [vmem:[%s5665_s30 + $0x670] sm:$0xff]  }
  0xd7   : > { %4551 = vmatprep.subr.bf16.mxu1 %v5031_v26  ;;  %v5077_v26 = vld [vmem:[%s5665_s30 + $0x488] sm:$0xff]  }
  0xd9   : > { %4530 = vmatpush3.bf16.msra.mxu0 %v5032_v28  ;;  %v5079_v28 = vld [vmem:[%s5665_s30 + $0x4c0] sm:$0xff]  }
  0xda   : > { %4531 = vmatprep.subr.bf16.mxu0 %v5034_v30  ;;  %4552 = vmatpush3.bf16.msra.mxu1 %v5033_v31  ;;  %v5865_v30 = vsel %vm5740_vm14, %v431_v22, %v436_v25  ;;  %v5080_v31 = vld [vmem:[%s5665_s30 + $0x400] sm:$0xff]   ;;  %v5119_v22 = vld [vmem:[%s5665_s30 + $0x6f0] sm:$0xff]   ;;  %v5122_v25 = vld [vmem:[%s5665_s30 + $0x668] sm:$0xff]  }
  0xdb   : > { %4553 = vmatprep.subr.bf16.mxu1 %v5035_v32  ;;  %v652_v32 = vcombine.low %v5748_v29, %v5865_v30 }
  0xdd   : > { %4532 = vmatpush3.bf16.msra.mxu0 %v5036_v33  ;;  %v5082_v33 = vld [vmem:[%s5665_s30 + $0x578] sm:$0xff]  }
  0xde   : > { %4533 = vmatprep.subr.bf16.mxu0 %v5038_v34  ;;  %4554 = vmatpush3.bf16.msra.mxu1 %v5037_v35  ;;  %v5081_v34 = vld [vmem:[%s5665_s30 + $0x480] sm:$0xff]   ;;  %v659_v35 = vrot.slane %v652_v32, %v5671_v13 }
  0xdf   : > { %4555 = vmatprep.subr.bf16.mxu1 %v5039_v36  ;;  %v5083_v36 = vld [vmem:[%s5665_s30 + $0x5f8] sm:$0xff]   ;;  %v5126_v32 = vld [vmem:[%s5665_s30 + $0x660] sm:$0xff]  }
  0xe1   : > { %4534 = vmatpush3.bf16.msra.mxu0 %v5040_v37  ;;  %v660_v37 = vcombine.high %v659_v35, %v659_v35 }
  0xe2   : > { %4535 = vmatprep.subr.bf16.mxu0 %v5042_v38  ;;  %4556 = vmatpush3.bf16.msra.mxu1 %v5041_v39  ;;  %v667_v38 = vrot.slane %v659_v35, %v5671_v13  ;;  %v5084_v39 = vld [vmem:[%s5665_s30 + $0x538] sm:$0xff]   ;;  %v5129_v35 = vld [vmem:[%s5665_s30 + $0x6a0] sm:$0xff]  }
  0xe3   : > { %4557 = vmatprep.subr.bf16.mxu1 %v5043_v40  ;;  %v674_v29 = vrot.slane %v660_v37, %v5671_v13  ;;  %v5085_v40 = vld [vmem:[%s5665_s30 + $0x5b8] sm:$0xff]  }
  0xe4   : > { %v675_v42 = vcombine.high %v667_v38, %v667_v38  ;;  %v5131_v37 = vld [vmem:[%s5665_s30 + $0x6d8] sm:$0xff]  }
  0xe5   : > { %4536 = vmatpush3.bf16.msra.mxu0 %v5044_v44  ;;  %v676_v44 = vcombine.high %v674_v29, %v674_v29 }
  0xe6   : > { %4537 = vmatprep.subr.bf16.mxu0 %v5046_v45  ;;  %4558 = vmatpush3.bf16.msra.mxu1 %v5045_v47  ;;  %v5087_v45 = vld [vmem:[%s5665_s30 + $0x5f0] sm:$0xff]  }
  0xe7   : > { %4559 = vmatprep.subr.bf16.mxu1 %v5047_v48  ;;  %v5089_v47 = vld [vmem:[%s5665_s30 + $0x5b0] sm:$0xff]   ;;  %v5090_v48 = vld [vmem:[%s5665_s30 + $0x568] sm:$0xff]  }
  0xe9   : > { %4538 = vmatpush3.bf16.msra.mxu0 %v5048_v50  ;;  %v5092_v50 = vld [vmem:[%s5665_s30 + $0x528] sm:$0xff]  }
  0xea   : > { %4567 = vmatprep.subr.bf16.mxu0 %v5050_v53  ;;  %4560 = vmatpush3.bf16.msra.mxu1 %v5049_v54  ;;  %v5095_v53 = vld [vmem:[%s5665_s30 + $0x5e0] sm:$0xff]  }
  0xeb   : > { %4589 = vmatprep.subr.bf16.mxu1 %v5051_v56  ;;  %v5096_v54 = vld [vmem:[%s5665_s30 + $0x520] sm:$0xff]   ;;  %v5098_v56 = vld [vmem:[%s5665_s30 + $0x558] sm:$0xff]  }
  0xec   : > { %3378 = vmatmul.mubr.bf16.vlgmr.msra.gmra.mxu0 %v638_v52  ;;  %v5094_v52 = vld [vmem:[%s5665_s30 + $0x560] sm:$0xff]  }
  0xed   : > { %4568 = vmatpush3.bf16.msra.mxu0 %v5052_v57  ;;  %3418 = vmatmul.mubr.bf16.vlgmr.msra.gmra.mxu1 %v646_v58  ;;  %v5099_v57 = vld [vmem:[%s5665_s30 + $0x5d8] sm:$0xff]  }
  0xee   : > { %4569 = vmatprep.subr.bf16.mxu0 %v5054_v59  ;;  %4590 = vmatpush3.bf16.msra.mxu1 %v5053_v60  ;;  %v5100_v58 = vld [vmem:[%s5665_s30 + $0x518] sm:$0xff]   ;;  %v5102_v60 = vld [vmem:[%s5665_s30 + $0x550] sm:$0xff]  }
  0xef   : > { %4591 = vmatprep.subr.bf16.mxu1 %v5055_v62  ;;  %3457 = vmatprep.mubr.bf16.mxu0 %v674_v29  ;;  %v5101_v59 = vld [vmem:[%s5665_s30 + $0x598] sm:$0xff]   ;;  %v5103_v62 = vld [vmem:[%s5665_s30 + $0x5d0] sm:$0xff]  }
  0xf0   : > { %3497 = vmatprep.mubr.bf16.mxu1 %v676_v44  ;;  %v5134_v29 = vld [vmem:[%s5665_s30 + $0x650] sm:$0xff]  }
  0xf1   : > { %4570 = vmatpush3.bf16.msra.mxu0 %v5056_v63  ;;  %v5104_v63 = vld [vmem:[%s5665_s30 + $0x510] sm:$0xff]  }
  0xf2   : > { %4571 = vmatprep.subr.bf16.mxu0 %v5058_v0  ;;  %4592 = vmatpush3.bf16.msra.mxu1 %v5057_v1  ;;  %v5105_v0 = vld [vmem:[%s5665_s30 + $0x590] sm:$0xff]   ;;  %v5106_v1 = vld [vmem:[%s5665_s30 + $0x548] sm:$0xff]  }
  0xf3   : > { %4593 = vmatprep.subr.bf16.mxu1 %v5059_v2  ;;  %v5900_v2 = vld.sshfl [vmem:[%s5643_s27 + $0x10] sm:$0xf0 pattern:$0x75316420] }
  0xf4   : > { %v5136_v44 = vld [vmem:[%s5665_s30 + $0x610] sm:$0xff]  }
  0xf5   : > { %4572 = vmatpush3.bf16.msra.mxu0 %v5060_v3  ;;  %v5107_v3 = vld [vmem:[%s5665_s30 + $0x5c8] sm:$0xff]  }
  0xf6   : > { %4573 = vmatprep.subr.bf16.mxu0 %v5062_v4  ;;  %4594 = vmatpush3.bf16.msra.mxu1 %v5061_v5  ;;  %v4091_v4 = vcombine.high %v5779_v61, %v5900_v2  ;;  %v5108_v5 = vld [vmem:[%s5665_s30 + $0x508] sm:$0xff]  }
  0xf7   : > { %4595 = vmatprep.subr.bf16.mxu1 %v5063_v6  ;;  %v5109_v6 = vld [vmem:[%s5665_s30 + $0x588] sm:$0xff]  }
  0xf9   : > { %4574 = vmatpush3.bf16.msra.mxu0 %v5064_v7  ;;  %v688_v7 = vrot.slane %v4091_v4, %v5671_v13 }
  0xfa   : > { %4575 = vmatprep.subr.bf16.mxu0 %v5066_v8  ;;  %4596 = vmatpush3.bf16.msra.mxu1 %v5065_v9  ;;  %v5110_v8 = vld [vmem:[%s5665_s30 + $0x540] sm:$0xff]  }
  0xfb   : > { %4597 = vmatprep.subr.bf16.mxu1 %v5067_v10  ;;  %v5111_v9 = vld [vmem:[%s5665_s30 + $0x5c0] sm:$0xff]   ;;  %v689_v10 = vcombine.high %v688_v7, %v688_v7 }
  0xfd   : > { %4576 = vmatpush3.bf16.msra.mxu0 %v5068_v11  ;;  %v5112_v11 = vld [vmem:[%s5665_s30 + $0x500] sm:$0xff]   ;;  %v703_v61 = vrot.slane %v689_v10, %v5671_v13 }
  0xfe   : > { %4577 = vmatprep.subr.bf16.mxu0 %v5070_v12  ;;  %4598 = vmatpush3.bf16.msra.mxu1 %v5069_v14  ;;  %v5113_v12 = vld [vmem:[%s5665_s30 + $0x580] sm:$0xff]   ;;  %v696_v14 = vrot.slane %v688_v7, %v5671_v13 }
  0xff   : > { %4599 = vmatprep.subr.bf16.mxu1 %v5071_v15  ;;  %v5114_v15 = vld [vmem:[%s5665_s30 + $0x678] sm:$0xff]  }
 0x101   : > { %4578 = vmatpush3.bf16.msra.mxu0 %v5072_v16  ;;  %v705_v16 = vcombine.high %v703_v61, %v703_v61 }
 0x102   : > { %4579 = vmatprep.subr.bf16.mxu0 %v5074_v17  ;;  %4600 = vmatpush3.bf16.msra.mxu1 %v5073_v18  ;;  %v5115_v17 = vld [vmem:[%s5665_s30 + $0x6f8] sm:$0xff]  }
 0x103   : > { %4601 = vmatprep.subr.bf16.mxu1 %v5075_v20  ;;  %v5116_v18 = vld [vmem:[%s5665_s30 + $0x638] sm:$0xff]   ;;  %v704_v20 = vcombine.high %v696_v14, %v696_v14 }
 0x105   : > { %4580 = vmatpush3.bf16.msra.mxu0 %v5076_v23  ;;  %v5120_v23 = vld [vmem:[%s5665_s30 + $0x630] sm:$0xff]  }
 0x106   : > { %4581 = vmatprep.subr.bf16.mxu0 %v5078_v24  ;;  %4602 = vmatpush3.bf16.msra.mxu1 %v5077_v26  ;;  %v5121_v24 = vld [vmem:[%s5665_s30 + $0x6b0] sm:$0xff]   ;;  %v5123_v26 = vld [vmem:[%s5665_s30 + $0x6e8] sm:$0xff]  }
 0x107   : > { %4603 = vmatprep.subr.bf16.mxu1 %v5079_v28  ;;  %v5124_v28 = vld [vmem:[%s5665_s30 + $0x628] sm:$0xff]  }
 0x109   : > { %4582 = vmatpush3.bf16.msra.mxu0 %v5080_v31  ;;  %v5125_v31 = vld [vmem:[%s5665_s30 + $0x6a8] sm:$0xff]  }
 0x10a   : > { %4611 = vmatprep.subr.bf16.mxu0 %v5082_v33  ;;  %4604 = vmatpush3.bf16.msra.mxu1 %v5081_v34  ;;  %v5127_v33 = vld [vmem:[%s5665_s30 + $0x6e0] sm:$0xff]  }
 0x10b   : > { %4633 = vmatprep.subr.bf16.mxu1 %v5083_v36  ;;  %v5128_v34 = vld [vmem:[%s5665_s30 + $0x620] sm:$0xff]   ;;  %v5130_v36 = vld [vmem:[%s5665_s30 + $0x658] sm:$0xff]  }
 0x10c   : > { %3458 = vmatmul.mubr.bf16.vlgmr.msra.gmra.mxu0 %v667_v38  ;;  %v5132_v38 = vld [vmem:[%s5665_s30 + $0x618] sm:$0xff]  }
 0x10d   : > { %4612 = vmatpush3.bf16.msra.mxu0 %v5084_v39  ;;  %3498 = vmatmul.mubr.bf16.vlgmr.msra.gmra.mxu1 %v675_v42  ;;  %v5133_v39 = vld [vmem:[%s5665_s30 + $0x698] sm:$0xff]   ;;  %v5135_v42 = vld [vmem:[%s5665_s30 + $0x6d0] sm:$0xff]  }
 0x10e   : > { %4613 = vmatprep.subr.bf16.mxu0 %v5086_v43  ;;  %4634 = vmatpush3.bf16.msra.mxu1 %v5085_v40 }
 0x10f   : > { %4635 = vmatprep.subr.bf16.mxu1 %v5087_v45  ;;  %3537 = vmatprep.mubr.bf16.mxu0 %v703_v61  ;;  %v5151_v61 = vld [vmem:[%s5665_s30 + $0x7f0] sm:$0xff]  }
 0x110   : > { %3577 = vmatprep.mubr.bf16.mxu1 %v705_v16  ;;  %v5153_v16 = vld [vmem:[%s5665_s30 + $0x7b0] sm:$0xff]  }
 0x111   : > { %4614 = vmatpush3.bf16.msra.mxu0 %v5088_v46  ;;  %v5137_v46 = vld [vmem:[%s5665_s30 + $0x690] sm:$0xff]  }
 0x112   : > { %4615 = vmatprep.subr.bf16.mxu0 %v5090_v48  ;;  %4636 = vmatpush3.bf16.msra.mxu1 %v5089_v47 }
 0x113   : > { %4637 = vmatprep.subr.bf16.mxu1 %v5091_v49  ;;  %v5138_v49 = vld [vmem:[%s5665_s30 + $0x648] sm:$0xff]  }
 0x115   : > { %4616 = vmatpush3.bf16.msra.mxu0 %v5092_v50 }
 0x116   : > { %4617 = vmatprep.subr.bf16.mxu0 %v5094_v52  ;;  %4638 = vmatpush3.bf16.msra.mxu1 %v5093_v51  ;;  %v4079_v52 = vld.sshfl [vmem:[%s5643_s27 + $0x18] sm:$0xf pattern:$0x75316420] }
 0x117   : > { %4639 = vmatprep.subr.bf16.mxu1 %v5095_v53 }
 0x119   : > { %4618 = vmatpush3.bf16.msra.mxu0 %v5096_v54  ;;  %v5139_v54 = vld [vmem:[%s5665_s30 + $0x6c8] sm:$0xff]  }
 0x11a   : > { %4619 = vmatprep.subr.bf16.mxu0 %v5098_v56  ;;  %4640 = vmatpush3.bf16.msra.mxu1 %v5097_v55  ;;  %v710_v55 = vcombine.low %v5819_v41, %v4079_v52  ;;  %v5144_v41 = vld [vmem:[%s5665_s30 + $0x600] sm:$0xff]  }
 0x11b   : > { %4641 = vmatprep.subr.bf16.mxu1 %v5099_v57 }
 0x11d   : > { %4620 = vmatpush3.bf16.msra.mxu0 %v5100_v58  ;;  %v5140_v58 = vld [vmem:[%s5665_s30 + $0x608] sm:$0xff]  }
 0x11e   : > { %4621 = vmatprep.subr.bf16.mxu0 %v5102_v60  ;;  %4642 = vmatpush3.bf16.msra.mxu1 %v5101_v59  ;;  %v5142_v60 = vld [vmem:[%s5665_s30 + $0x640] sm:$0xff]  }
 0x11f   : > { %4643 = vmatprep.subr.bf16.mxu1 %v5103_v62  ;;  %v717_v62 = vrot.slane %v710_v55, %v5671_v13 }
 0x121   : > { %4622 = vmatpush3.bf16.msra.mxu0 %v5104_v63  ;;  %v5141_v63 = vld [vmem:[%s5665_s30 + $0x688] sm:$0xff]   ;;  %v725_v4 = vrot.slane %v717_v62, %v5671_v13 }
 0x122   : > { %4623 = vmatprep.subr.bf16.mxu0 %v5106_v1  ;;  %4644 = vmatpush3.bf16.msra.mxu1 %v5105_v0  ;;  %v5143_v0 = vld [vmem:[%s5665_s30 + $0x6c0] sm:$0xff]   ;;  %v718_v1 = vcombine.high %v717_v62, %v717_v62  ;;  %v5181_v62 = vld [vmem:[%s5665_s30 + $0x8b8] sm:$0xff]  }
 0x123   : > { %4645 = vmatprep.subr.bf16.mxu1 %v5107_v3  ;;  %v733_v10 = vcombine.high %v725_v4, %v725_v4 }
 0x124   : > { %v732_v3 = vrot.slane %v718_v1, %v5671_v13 }
 0x125   : > { %4624 = vmatpush3.bf16.msra.mxu0 %v5108_v5  ;;  %v5146_v5 = vld [vmem:[%s5665_s30 + $0x778] sm:$0xff]  }
 0x126   : > { %4625 = vmatprep.subr.bf16.mxu0 %v5110_v8  ;;  %4646 = vmatpush3.bf16.msra.mxu1 %v5109_v6  ;;  %v5145_v6 = vld [vmem:[%s5665_s30 + $0x680] sm:$0xff]   ;;  %v734_v7 = vcombine.high %v732_v3, %v732_v3  ;;  %v5147_v8 = vld [vmem:[%s5665_s30 + $0x7f8] sm:$0xff]  }
 0x127   : > { %4647 = vmatprep.subr.bf16.mxu1 %v5111_v9  ;;  %v5148_v9 = vld [vmem:[%s5665_s30 + $0x738] sm:$0xff]  }
 0x129   : > { %4626 = vmatpush3.bf16.msra.mxu0 %v5112_v11  ;;  %v5150_v11 = vld [vmem:[%s5665_s30 + $0x770] sm:$0xff]  }
 0x12a   : > { %4655 = vmatprep.subr.bf16.mxu0 %v5114_v15  ;;  %4648 = vmatpush3.bf16.msra.mxu1 %v5113_v12  ;;  %v5149_v12 = vld [vmem:[%s5665_s30 + $0x7b8] sm:$0xff]   ;;  %v5154_v15 = vld [vmem:[%s5665_s30 + $0x768] sm:$0xff]  }
 0x12b   : > { %4677 = vmatprep.subr.bf16.mxu1 %v5115_v17  ;;  %v5155_v17 = vld [vmem:[%s5665_s30 + $0x7e8] sm:$0xff]  }
 0x12c   : > { %3538 = vmatmul.mubr.bf16.vlgmr.msra.gmra.mxu0 %v696_v14  ;;  %v5152_v14 = vld [vmem:[%s5665_s30 + $0x730] sm:$0xff]  }
 0x12d   : > { %4656 = vmatpush3.bf16.msra.mxu0 %v5116_v18  ;;  %3578 = vmatmul.mubr.bf16.vlgmr.msra.gmra.mxu1 %v704_v20  ;;  %v5156_v18 = vld [vmem:[%s5665_s30 + $0x728] sm:$0xff]  }
 0x12e   : > { %4657 = vmatprep.subr.bf16.mxu0 %v5118_v21  ;;  %4678 = vmatpush3.bf16.msra.mxu1 %v5117_v19  ;;  %v5158_v19 = vld [vmem:[%s5665_s30 + $0x760] sm:$0xff]   ;;  %v5157_v20 = vld [vmem:[%s5665_s30 + $0x7a8] sm:$0xff]  }
 0x12f   : > { %4679 = vmatprep.subr.bf16.mxu1 %v5119_v22  ;;  %3617 = vmatprep.mubr.bf16.mxu0 %v732_v3  ;;  %v5159_v21 = vld [vmem:[%s5665_s30 + $0x7e0] sm:$0xff]  }
 0x130   : > { %3657 = vmatprep.mubr.bf16.mxu1 %v734_v7  ;;  %v5160_v22 = vld [vmem:[%s5665_s30 + $0x720] sm:$0xff]  }
 0x131   : > { %4658 = vmatpush3.bf16.msra.mxu0 %v5120_v23  ;;  %v5162_v23 = vld [vmem:[%s5665_s30 + $0x758] sm:$0xff]  }
 0x132   : > { %4659 = vmatprep.subr.bf16.mxu0 %v5122_v25  ;;  %4680 = vmatpush3.bf16.msra.mxu1 %v5121_v24  ;;  %v5161_v24 = vld [vmem:[%s5665_s30 + $0x7a0] sm:$0xff]   ;;  %v5163_v25 = vld [vmem:[%s5665_s30 + $0x7d8] sm:$0xff]  }
 0x133   : > { %4681 = vmatprep.subr.bf16.mxu1 %v5123_v26  ;;  %v5164_v26 = vld [vmem:[%s5665_s30 + $0x718] sm:$0xff]  }
 0x135   : > { %4660 = vmatpush3.bf16.msra.mxu0 %v5124_v28  ;;  %v5166_v28 = vld [vmem:[%s5665_s30 + $0x750] sm:$0xff]  }
 0x136   : > { %4661 = vmatprep.subr.bf16.mxu0 %v5126_v32  ;;  %4682 = vmatpush3.bf16.msra.mxu1 %v5125_v31  ;;  %v5165_v31 = vld [vmem:[%s5665_s30 + $0x798] sm:$0xff]   ;;  %v5167_v32 = vld [vmem:[%s5665_s30 + $0x7d0] sm:$0xff]  }
 0x137   : > { %4683 = vmatprep.subr.bf16.mxu1 %v5127_v33  ;;  %v5168_v33 = vld [vmem:[%s5665_s30 + $0x710] sm:$0xff]  }
 0x139   : > { %4662 = vmatpush3.bf16.msra.mxu0 %v5128_v34  ;;  %v5170_v34 = vld [vmem:[%s5665_s30 + $0x748] sm:$0xff]  }
 0x13a   : > { %4663 = vmatprep.subr.bf16.mxu0 %v5130_v36  ;;  %4684 = vmatpush3.bf16.msra.mxu1 %v5129_v35  ;;  %v5169_v35 = vld [vmem:[%s5665_s30 + $0x790] sm:$0xff]   ;;  %v4083_v36 = vld.sshfl [vmem:[%s5643_s27 + $0x18] sm:$0xff pattern:$0x75316420] }
 0x13b   : > { %4685 = vmatprep.subr.bf16.mxu1 %v5131_v37  ;;  %v5171_v37 = vld [vmem:[%s5665_s30 + $0x7c8] sm:$0xff]  }
 0x13d   : > { %4664 = vmatpush3.bf16.msra.mxu0 %v5132_v38  ;;  %v497_v38 = vcombine.high %v4083_v36, %v4083_v36 }
 0x13e   : > { %4665 = vmatprep.subr.bf16.mxu0 %v5134_v29  ;;  %4686 = vmatpush3.bf16.msra.mxu1 %v5133_v39  ;;  %v508_v39 = vshrl.u32 %v4083_v36, 16  ;;  %v5172_v29 = vld [vmem:[%s5665_s30 + $0x708] sm:$0xff]  }
 0x13f   : > { %4687 = vmatprep.subr.bf16.mxu1 %v5135_v42  ;;  %v513_v42 = vshll.u32 %v497_v38, 16  ;;  %v5205_v36 = vld [vmem:[%s5665_s30 + $0x888] sm:$0xff]   ;;  %v5207_v38 = vld [vmem:[%s5665_s30 + $0x8c0] sm:$0xff]  }
 0x141   : > { %4666 = vmatpush3.bf16.msra.mxu0 %v5136_v44  ;;  %v5175_v44 = vld [vmem:[%s5665_s30 + $0x7c0] sm:$0xff]  }
 0x142   : > { %4667 = vmatprep.subr.bf16.mxu0 %v5138_v49  ;;  %4688 = vmatpush3.bf16.msra.mxu1 %v5137_v46  ;;  %v5176_v46 = vld [vmem:[%s5665_s30 + $0x700] sm:$0xff]  }
 0x143   : > { %4689 = vmatprep.subr.bf16.mxu1 %v5139_v54  ;;  %v5177_v49 = vld [vmem:[%s5665_s30 + $0x780] sm:$0xff]   ;;  %v5180_v54 = vld [vmem:[%s5665_s30 + $0x838] sm:$0xff]  }
 0x145   : > { %4668 = vmatpush3.bf16.msra.mxu0 %v5140_v58 }
 0x146   : > { %4669 = vmatprep.subr.bf16.mxu0 %v5142_v60  ;;  %4690 = vmatpush3.bf16.msra.mxu1 %v5141_v63 }
 0x147   : > { %4691 = vmatprep.subr.bf16.mxu1 %v5143_v0 }
 0x149   : > { %4670 = vmatpush3.bf16.msra.mxu0 %v5144_v41  ;;  %v5183_v41 = vld [vmem:[%s5665_s30 + $0x8f0] sm:$0xff]  }
 0x14a   : > { %4699 = vmatprep.subr.bf16.mxu0 %v5146_v5  ;;  %4692 = vmatpush3.bf16.msra.mxu1 %v5145_v6  ;;  %v5184_v5 = vld [vmem:[%s5665_s30 + $0x830] sm:$0xff]  }
 0x14b   : > { %4721 = vmatprep.subr.bf16.mxu1 %v5147_v8  ;;  %v5186_v8 = vld [vmem:[%s5665_s30 + $0x868] sm:$0xff]  }
 0x14c   : > { %v4407_v40 = vpop.f32.mrf.mxu0  ;;  %3618 = vmatmul.mubr.bf16.vlgmr.msra.gmra.mxu0 %v725_v4 }
 0x14d   : > { %v4429_v43 = vpop.f32.mrf.mxu1  ;;  %4700 = vmatpush3.bf16.msra.mxu0 %v5148_v9  ;;  %3658 = vmatmul.mubr.bf16.vlgmr.msra.gmra.mxu1 %v733_v10  ;;  %v5185_v10 = vld [vmem:[%s5665_s30 + $0x8b0] sm:$0xff]  }
 0x14e   : > { %v4408_v45 = vpop.f32.mrf.mxu0  ;;  %4701 = vmatprep.subr.bf16.mxu0 %v5150_v11  ;;  %4722 = vmatpush3.bf16.msra.mxu1 %v5149_v12  ;;  %v5188_v12 = vld [vmem:[%s5665_s30 + $0x828] sm:$0xff]  }
 0x14f   : > { %v4409_v47 = vadd.f32 %v4408_v45, %v4407_v40  ;;  %v4430_v48 = vpop.f32.mrf.mxu1  ;;  %4723 = vmatprep.subr.bf16.mxu1 %v5151_v61  ;;  %v5174_v40 = vld [vmem:[%s5665_s30 + $0x740] sm:$0xff]   ;;  %v515_v45 = vsel %vm5740_vm14, %v508_v39, %v513_v42 }
 0x150   : > { %v4431_v50 = vadd.f32 %v4430_v48, %v4429_v43  ;;  %v4410_v51 = vpop.f32.mrf.mxu0  ;;  %v5173_v43 = vld [vmem:[%s5665_s30 + $0x788] sm:$0xff]   ;;  %v5178_v48 = vld [vmem:[%s5665_s30 + $0x878] sm:$0xff]   ;;  %v5190_v61 = vld [vmem:[%s5665_s30 + $0x860] sm:$0xff]  }
 0x151   : > { %v4432_v53 = vpop.f32.mrf.mxu1  ;;  %4702 = vmatpush3.bf16.msra.mxu0 %v5152_v14  ;;  %v5179_v51 = vld [vmem:[%s5665_s30 + $0x8f8] sm:$0xff]   ;;  %v5189_v14 = vld [vmem:[%s5665_s30 + $0x8a8] sm:$0xff]   ;;  %v5208_v39 = vld [vmem:[%s5665_s30 + $0x800] sm:$0xff]  }
 0x152   : > { %v5942_v56 = vadd.f32 %v4431_v50, %v4409_v47  ;;  %v4411_v57 = vpop.f32.mrf.mxu0  ;;  %4703 = vmatprep.subr.bf16.mxu0 %v5154_v15  ;;  %4724 = vmatpush3.bf16.msra.mxu1 %v5153_v16  ;;  %v739_v47 = vcombine.low %v5865_v30, %v515_v45  ;;  %v5191_v15 = vld [vmem:[%s5665_s30 + $0x8e0] sm:$0xff]  }
 0x153   : > { %v4433_v59 = vpop.f32.mrf.mxu1  ;;  %4725 = vmatprep.subr.bf16.mxu1 %v5155_v17  ;;  %v5192_v16 = vld [vmem:[%s5665_s30 + $0x820] sm:$0xff]   ;;  %v5194_v17 = vld [vmem:[%s5665_s30 + $0x858] sm:$0xff]  }
 0x154   : > { %v746_v50 = vrot.slane %v739_v47, %v5671_v13  ;;  %v5182_v59 = vld [vmem:[%s5665_s30 + $0x870] sm:$0xff]  }
 0x155   : > { %4704 = vmatpush3.bf16.msra.mxu0 %v5156_v18  ;;  %v5193_v18 = vld [vmem:[%s5665_s30 + $0x8a0] sm:$0xff]  }
 0x156   : > { %4705 = vmatprep.subr.bf16.mxu0 %v5158_v19  ;;  %4726 = vmatpush3.bf16.msra.mxu1 %v5157_v20  ;;  %v747_v52 = vcombine.high %v746_v50, %v746_v50  ;;  %v754_v27 = vrot.slane %v746_v50, %v5671_v13  ;;  %v5195_v19 = vld [vmem:[%s5665_s30 + $0x8d8] sm:$0xff]  }
 0x157   : > { %4727 = vmatprep.subr.bf16.mxu1 %v5159_v21  ;;  %v5196_v20 = vld [vmem:[%s5665_s30 + $0x818] sm:$0xff]   ;;  %v5198_v21 = vld [vmem:[%s5665_s30 + $0x850] sm:$0xff]  }
 0x158   : > { %v761_v30 = vrot.slane %v747_v52, %v5671_v13  ;;  %v762_v57 = vcombine.high %v754_v27, %v754_v27 }
 0x159   : > { %4706 = vmatpush3.bf16.msra.mxu0 %v5160_v22  ;;  %v5197_v22 = vld [vmem:[%s5665_s30 + $0x898] sm:$0xff]  }
 0x15a   : > { %4707 = vmatprep.subr.bf16.mxu0 %v5162_v23  ;;  %4728 = vmatpush3.bf16.msra.mxu1 %v5161_v24  ;;  %v763_v60 = vcombine.high %v761_v30, %v761_v30  ;;  %v5199_v23 = vld [vmem:[%s5665_s30 + $0x8d0] sm:$0xff]  }
 0x15b   : > { %4729 = vmatprep.subr.bf16.mxu1 %v5163_v25  ;;  %3697 = vmatprep.mubr.bf16.mxu0 %v761_v30  ;;  %v5200_v24 = vld [vmem:[%s5665_s30 + $0x810] sm:$0xff]   ;;  %v5202_v25 = vld [vmem:[%s5665_s30 + $0x848] sm:$0xff]  }
 0x15c   : > { %3737 = vmatprep.mubr.bf16.mxu1 %v763_v60 }
 0x15d   : > { %4708 = vmatpush3.bf16.msra.mxu0 %v5164_v26  ;;  %v4089_v26 = vld.sshfl [vmem:[%s5643_s27 + $0x18] sm:$0xf0 pattern:$0x75316420] }
 0x15e   : > { %4709 = vmatprep.subr.bf16.mxu0 %v5166_v28  ;;  %4730 = vmatpush3.bf16.msra.mxu1 %v5165_v31  ;;  %v5201_v28 = vld [vmem:[%s5665_s30 + $0x890] sm:$0xff]   ;;  %v4092_v31 = vcombine.high %v5900_v2, %v4089_v26 }
 0x15f   : > { %4731 = vmatprep.subr.bf16.mxu1 %v5167_v32  ;;  %v5203_v32 = vld [vmem:[%s5665_s30 + $0x8c8] sm:$0xff]  }
 0x161   : > { %4710 = vmatpush3.bf16.msra.mxu0 %v5168_v33  ;;  %v5204_v33 = vld [vmem:[%s5665_s30 + $0x808] sm:$0xff]  }
 0x162   : > { %4711 = vmatprep.subr.bf16.mxu0 %v5170_v34  ;;  %4732 = vmatpush3.bf16.msra.mxu1 %v5169_v35  ;;  %v775_v34 = vrot.slane %v4092_v31, %v5671_v13  ;;  %v5206_v35 = vld [vmem:[%s5665_s30 + $0x840] sm:$0xff]  }
 0x163   : > { %4733 = vmatprep.subr.bf16.mxu1 %v5171_v37 }
 0x164   : > { %v776_v37 = vcombine.high %v775_v34, %v775_v34  ;;  %v783_v2 = vrot.slane %v775_v34, %v5671_v13 }
 0x165   : > { %4712 = vmatpush3.bf16.msra.mxu0 %v5172_v29 }
 0x166   : > { %4713 = vmatprep.subr.bf16.mxu0 %v5174_v40  ;;  %4734 = vmatpush3.bf16.msra.mxu1 %v5173_v43  ;;  %v790_v29 = vrot.slane %v776_v37, %v5671_v13  ;;  %v5209_v40 = vld [vmem:[%s5665_s30 + $0x880] sm:$0xff]   ;;  %v791_v45 = vcombine.high %v783_v2, %v783_v2 }
 0x167   : > { %4735 = vmatprep.subr.bf16.mxu1 %v5175_v44 }
 0x168   : > { %v792_v42 = vcombine.high %v790_v29, %v790_v29 }
 0x169   : > { %4714 = vmatpush3.bf16.msra.mxu0 %v5176_v46 }
 0x16a   : > { %4743 = vmatprep.subr.bf16.mxu0 %v5178_v48  ;;  %4736 = vmatpush3.bf16.msra.mxu1 %v5177_v49 }
 0x16b   : > { %4765 = vmatprep.subr.bf16.mxu1 %v5179_v51 }
 0x16c   : > { %v4451_v53 = vpop.f32.mrf.mxu0  ;;  %3698 = vmatmul.mubr.bf16.vlgmr.msra.gmra.mxu0 %v754_v27 }
 0x16d   : > { %v4473_v55 = vpop.f32.mrf.mxu1  ;;  %4744 = vmatpush3.bf16.msra.mxu0 %v5180_v54  ;;  %3738 = vmatmul.mubr.bf16.vlgmr.msra.gmra.mxu1 %v762_v57 }
 0x16e   : > { %v4452_v58 = vpop.f32.mrf.mxu0  ;;  %4745 = vmatprep.subr.bf16.mxu0 %v5182_v59  ;;  %4766 = vmatpush3.bf16.msra.mxu1 %v5181_v62 }
 0x16f   : > { %v4453_v63 = vadd.f32 %v4452_v58, %v4451_v53  ;;  %v4474_v0 = vpop.f32.mrf.mxu1  ;;  %4767 = vmatprep.subr.bf16.mxu1 %v5183_v41  ;;  %3777 = vmatprep.mubr.bf16.mxu0 %v790_v29 }
 0x170   : > { %v4454_v1 = vpop.f32.mrf.mxu0  ;;  %v4475_v4 = vadd.f32 %v4474_v0, %v4473_v55  ;;  %3817 = vmatprep.mubr.bf16.mxu1 %v792_v42 }
 0x171   : > { %v3220_v3 = vadd.f32 %v4453_v63, %v5942_v56  ;;  %v4476_v6 = vpop.f32.mrf.mxu1  ;;  %v5187_v56 = vld [vmem:[%s5665_s30 + $0x8e8] sm:$0xff]   ;;  %4746 = vmatpush3.bf16.msra.mxu0 %v5184_v5 }
 0x172   : > { %v4455_v7 = vpop.f32.mrf.mxu0  ;;  %4747 = vmatprep.subr.bf16.mxu0 %v5186_v8  ;;  %4768 = vmatpush3.bf16.msra.mxu1 %v5185_v10 }
 0x173   : > { %v6001_v9 = vadd.f32 %v4475_v4, %v3220_v3  ;;  %v4477_v11 = vpop.f32.mrf.mxu1  ;;  %4769 = vmatprep.subr.bf16.mxu1 %v5187_v56 }
 0x175   : > { %4748 = vmatpush3.bf16.msra.mxu0 %v5188_v12 }
 0x176   : > { %4749 = vmatprep.subr.bf16.mxu0 %v5190_v61  ;;  %4770 = vmatpush3.bf16.msra.mxu1 %v5189_v14 }
 0x177   : > { %4771 = vmatprep.subr.bf16.mxu1 %v5191_v15 }
 0x179   : > { %4750 = vmatpush3.bf16.msra.mxu0 %v5192_v16 }
 0x17a   : > { %4751 = vmatprep.subr.bf16.mxu0 %v5194_v17  ;;  %4772 = vmatpush3.bf16.msra.mxu1 %v5193_v18 }
 0x17b   : > { %4773 = vmatprep.subr.bf16.mxu1 %v5195_v19 }
 0x17d   : > { %4752 = vmatpush3.bf16.msra.mxu0 %v5196_v20 }
 0x17e   : > { %4753 = vmatprep.subr.bf16.mxu0 %v5198_v21  ;;  %4774 = vmatpush3.bf16.msra.mxu1 %v5197_v22 }
 0x17f   : > { %4775 = vmatprep.subr.bf16.mxu1 %v5199_v23 }
 0x181   : > { %4754 = vmatpush3.bf16.msra.mxu0 %v5200_v24 }
 0x182   : > { %4755 = vmatprep.subr.bf16.mxu0 %v5202_v25  ;;  %4776 = vmatpush3.bf16.msra.mxu1 %v5201_v28 }
 0x183   : > { %4777 = vmatprep.subr.bf16.mxu1 %v5203_v32 }
 0x185   : > { %4756 = vmatpush3.bf16.msra.mxu0 %v5204_v33 }
 0x186   : > { %4757 = vmatprep.subr.bf16.mxu0 %v5206_v35  ;;  %4778 = vmatpush3.bf16.msra.mxu1 %v5205_v36 }
 0x187   : > { %4779 = vmatprep.subr.bf16.mxu1 %v5207_v38 }
 0x189   : > { %4758 = vmatpush3.bf16.msra.mxu0 %v5208_v39 }
 0x18a   : > { %4780 = vmatpush3.bf16.msra.mxu1 %v5209_v40 }
 0x18c   : > { %v4495_v43 = vpop.f32.mrf.mxu0  ;;  %3778 = vmatmul.mubr.bf16.vlgmr.msra.gmra.mxu0 %v783_v2 }
 0x18d   : > { %v4517_v44 = vpop.f32.mrf.mxu1  ;;  %3818 = vmatmul.mubr.bf16.vlgmr.msra.gmra.mxu1 %v791_v45 }
 0x18e   : > { %v4496_v46 = vpop.f32.mrf.mxu0 }
 0x18f   : > { %v4497_v47 = vadd.f32 %v4496_v46, %v4495_v43  ;;  %v4518_v48 = vpop.f32.mrf.mxu1 }
 0x190   : > { %v4498_v49 = vpop.f32.mrf.mxu0  ;;  %v4519_v51 = vadd.f32 %v4518_v48, %v4517_v44 }
 0x191   : > { %v3300_v50 = vadd.f32 %v4497_v47, %v6001_v9  ;;  %v4520_v13 = vpop.f32.mrf.mxu1 }
 0x192   : > { %v4499_v52 = vpop.f32.mrf.mxu0 }
 0x193   : > { %v3340_v27 = vadd.f32 %v4519_v51, %v3300_v50  ;;  %v4521_v53 = vpop.f32.mrf.mxu1 }
 0x1ac   : > { %v4539_v30 = vpop.f32.mrf.mxu0 }
 0x1ad   : > { %v4561_v54 = vpop.f32.mrf.mxu1 }
 0x1ae   : > { %v4540_v55 = vpop.f32.mrf.mxu0 }
 0x1af   : > { %v4541_v57 = vadd.f32 %v4540_v55, %v4539_v30  ;;  %v4562_v58 = vpop.f32.mrf.mxu1 }
 0x1b0   : > { %v4542_v59 = vpop.f32.mrf.mxu0  ;;  %v4563_v62 = vadd.f32 %v4562_v58, %v4561_v54  ;;  %v797_v58 = vld [vmem:[#allocation2] sm:$0xf] }
 0x1b1   : > { %v3380_v60 = vadd.f32 %v4541_v57, %v3340_v27  ;;  %v4564_v63 = vpop.f32.mrf.mxu1 }
 0x1b2   : > { %v4543_v0 = vpop.f32.mrf.mxu0 }
 0x1b3   : > { %v3420_v1 = vadd.f32 %v4563_v62, %v3380_v60  ;;  %v4565_v41 = vpop.f32.mrf.mxu1 }
 0x1cc   : > { %v4583_v3 = vpop.f32.mrf.mxu0 }
 0x1cd   : > { %v4605_v4 = vpop.f32.mrf.mxu1 }
 0x1ce   : > { %v4584_v5 = vpop.f32.mrf.mxu0 }
 0x1cf   : > { %v4585_v6 = vadd.f32 %v4584_v5, %v4583_v3  ;;  %v4606_v7 = vpop.f32.mrf.mxu1 }
 0x1d0   : > { %v4586_v8 = vpop.f32.mrf.mxu0  ;;  %v4607_v10 = vadd.f32 %v4606_v7, %v4605_v4 }
 0x1d1   : > { %v3460_v9 = vadd.f32 %v4585_v6, %v3420_v1  ;;  %v4608_v11 = vpop.f32.mrf.mxu1 }
 0x1d2   : > { %v4587_v56 = vpop.f32.mrf.mxu0 }
 0x1d3   : > { %v3500_v12 = vadd.f32 %v4607_v10, %v3460_v9  ;;  %v4609_v61 = vpop.f32.mrf.mxu1 }
 0x1ec   : > { %v4627_v14 = vpop.f32.mrf.mxu0 }
 0x1ed   : > { %v4649_v15 = vpop.f32.mrf.mxu1 }
 0x1ee   : > { %v4628_v16 = vpop.f32.mrf.mxu0 }
 0x1ef   : > { %v4629_v17 = vadd.f32 %v4628_v16, %v4627_v14  ;;  %v4650_v18 = vpop.f32.mrf.mxu1 }
 0x1f0   : > { %v4630_v19 = vpop.f32.mrf.mxu0  ;;  %v4651_v21 = vadd.f32 %v4650_v18, %v4649_v15 }
 0x1f1   : > { %v3540_v20 = vadd.f32 %v4629_v17, %v3500_v12  ;;  %v4652_v22 = vpop.f32.mrf.mxu1 }
 0x1f2   : > { %v4631_v23 = vpop.f32.mrf.mxu0 }
 0x1f3   : > { %v3580_v24 = vadd.f32 %v4651_v21, %v3540_v20  ;;  %v4653_v25 = vpop.f32.mrf.mxu1 }
 0x20c   : > { %v4671_v26 = vpop.f32.mrf.mxu0 }
 0x20d   : > { %v4693_v28 = vpop.f32.mrf.mxu1 }
 0x20e   : > { %v4672_v31 = vpop.f32.mrf.mxu0 }
 0x20f   : > { %v4694_v32 = vpop.f32.mrf.mxu1  ;;  %v4673_v44 = vadd.f32 %v4672_v31, %v4671_v26 }
 0x210   : > { %v4674_v33 = vpop.f32.mrf.mxu0  ;;  %v4695_v46 = vadd.f32 %v4694_v32, %v4693_v28 }
 0x211   : > { %v4696_v34 = vpop.f32.mrf.mxu1  ;;  %v3620_v45 = vadd.f32 %v4673_v44, %v3580_v24 }
 0x212   : > { %v4675_v35 = vpop.f32.mrf.mxu0 }
 0x213   : > { %v4697_v36 = vpop.f32.mrf.mxu1  ;;  %v3660_v48 = vadd.f32 %v4695_v46, %v3620_v45 }
 0x22c   : > { %v4715_v37 = vpop.f32.mrf.mxu0 }
 0x22d   : > { %v4737_v38 = vpop.f32.mrf.mxu1 }
 0x22e   : > { %v4716_v39 = vpop.f32.mrf.mxu0 }
 0x22f   : > { %v4738_v29 = vpop.f32.mrf.mxu1  ;;  %v4717_v47 = vadd.f32 %v4716_v39, %v4715_v37 }
 0x230   : > { %v4718_v2 = vpop.f32.mrf.mxu0  ;;  %v4739_v50 = vadd.f32 %v4738_v29, %v4737_v38 }
 0x231   : > { %v4740_v40 = vpop.f32.mrf.mxu1  ;;  %v3700_v49 = vadd.f32 %v4717_v47, %v3660_v48 }
 0x232   : > { %v4719_v42 = vpop.f32.mrf.mxu0 }
 0x233   : > { %v4741_v43 = vpop.f32.mrf.mxu1  ;;  %v3740_v27 = vadd.f32 %v4739_v50, %v3700_v49 }
 0x24c   : > { %v4759_v51 = vpop.f32.mrf.mxu0 }
 0x24d   : > { %v4781_v13 = vpop.f32.mrf.mxu1 }
 0x24e   : > { %v4760_v52 = vpop.f32.mrf.mxu0 }
 0x24f   : > { %v4761_v53 = vadd.f32 %v4760_v52, %v4759_v51  ;;  %v4782_v30 = vpop.f32.mrf.mxu1 }
 0x250   : > { %v4762_v54 = vpop.f32.mrf.mxu0  ;;  %v4783_v57 = vadd.f32 %v4782_v30, %v4781_v13 }
 0x251   : > { %v3780_v55 = vadd.f32 %v4761_v53, %v3740_v27  ;;  %v4784_v59 = vpop.f32.mrf.mxu1 }
 0x252   : > { %v4763_v60 = vpop.f32.mrf.mxu0 }
 0x253   : > { %v3820_v62 = vadd.f32 %v4783_v57, %v3780_v55  ;;  %v4785_v63 = vpop.f32.mrf.mxu1  ;;  %3830 = sbr.rel (%p4382_p1) target bundleno = 626 (0x272), region = 52 }
 0x255   : > { %v3825_v0 = vadd.f32 %v3820_v62, %v797_v58 }
 0x257   : > { %3826 = vst [vmem:[#allocation2] sm:$0xf] %v3825_v0 }
 0x258   : > { %v4383_v41 = vld [vmem:[#allocation8] ss:$0 sm:$0xff]  ;;  %vm3842_vm15 = vcmask 1043456   ;;  %vm3858_vm0 = vcmask 1040384  }
 0x25e   : > { %v3831_v1 = vld [vmem:[#allocation2] sm:$0xf] }
 0x25f   : > { %v3839_v3 = vadd.f32 %v4383_v41, %v3831_v1 }
 0x261   : > { %v3840_v4 = vpack.c.bf16 %v3839_v3, %v3839_v3  ;;  %v3843_v5 = vsel %vm3842_vm15, %v3839_v3, 0.0  ;;  %v3850_v6 = vmul.f32 %v3839_v3, %v3839_v3 }
 0x262   : > { %v3844_v7 = vrot.slane %v3843_v5, 4 }
 0x263   : > { %3841 = vst [vmem:[%s5657_s7] sm:$0x3] %v3840_v4  ;;  %v3851_v8 = vsel %vm3842_vm15, %v3850_v6, 0.0 }
 0x264   : > { %v3845_v9 = vadd.f32 %v3844_v7, %v3843_v5  ;;  %v3852_v10 = vrot.slane %v3851_v8, 4 }
 0x266   : > { %v3846_v11 = vrot.slane %v3845_v9, 2  ;;  %v3853_v56 = vadd.f32 %v3852_v10, %v3851_v8 }
 0x268   : > { %v3847_v12 = vadd.f32 %v3846_v11, %v3845_v9  ;;  %v3854_v61 = vrot.slane %v3853_v56, 2 }
 0x26a   : > { %v3848_v14 = vrot.slane %v3847_v12, 1  ;;  %v3855_v15 = vadd.f32 %v3854_v61, %v3853_v56 }
 0x26c   : > { %v3849_v16 = vadd.f32 %v3848_v14, %v3847_v12  ;;  %v3856_v17 = vrot.slane %v3855_v15, 1 }
 0x26e   : > { %v3857_v18 = vadd.f32 %v3856_v17, %v3855_v15 }
 0x270   : > { %v3859_v19 = vsel %vm3858_vm0, %v3849_v16, %v3857_v18 }
 0x271   : > { %3860 = vst [vmem:[%s5659_s8] sm:$0x3] %v3859_v19 }
 0x272 PF: > { %s6150_s21 = sld [smem:[#allocation17_spill]]  ;;  %s3881_s6 = sshll.u32 %s5657_s7, 4  ;;  %s3882_s6 = int_to_ptr.vmem [resolvable:$true] %s3881_s6 }
 0x273   : > { %s6151_s11 = sld [smem:[#allocation19_spill]]  ;;  %s3862_s26 = scalar_lea.sflag [#allocation5], %s5654_s4 }
 0x274   : > { %s6152_s10 = sld [smem:[#allocation24_spill]]  ;;  %s5291_s3 = scalar_lea.vmem %s3882_s6, 32 }
 0x275   : > { %p5292_p3 = scmp.ne.s32.totalorder %s3882_s6, %s5291_s3  ;;  %s5456_s23 = smov [#allocation9]  }
 0x276   : > { %s5295_s5 = sshll.u32 %s5456_s23, 4  ;;  %s5296_s5 = int_to_ptr.vmem [resolvable:$false] %s5295_s5 }
 0x277   : > { %s5297_s18 = scalar_lea.vmem %s5296_s5, 64  ;;  %p5298_p5 = scmp.lt.s32.totalorder %s3882_s6, %s5296_s5 }
 0x278   : > { %s4386_s13 = sshll.u32 %s6150_s21, 5  ;;  %p5299_p8 = scmp.lt.s32.totalorder %s5297_s18, %s5291_s3 }
 0x279   : > { %p6153_p10 = scmp.ne.s32.totalorder %s6151_s11, 0 }
 0x27a   : > { %s3879_s15 = scalar_lea.hbm %s6152_s10, %s4386_s13  ;;  %p5300_p7 = por %p5299_p8, %p5298_p5 }
 0x27b   : > { %p5293_p12 = pnand %p5292_p3, %p6153_p10 }
 0x27d   : > { %p5294_p6 = pneg %p5293_p12 }
 0x27f   : > { %p5301_p9 = pnand %p5300_p7, %p5294_p6 }
 0x281   : > { %5304 = shalt.err (!%p5301_p9)
}
 0x282   : > { %s5305_s12 = scalar_lea.hbm %s3879_s15, 32  ;;  %s5309_s7 = scalar_lea.hbm %s6152_s10, 64 }
 0x283   : > { %p5306_p0 = scmp.ne.s32.totalorder %s3879_s15, %s5305_s12  ;;  %p5310_p4 = scmp.lt.s32.totalorder %s3879_s15, %s6152_s10 }
 0x284   : > { %p5311_p11 = scmp.lt.s32.totalorder %s5309_s7, %s5305_s12 }
 0x285   : > { %p5307_p13 = pnand %p5306_p0, %p6153_p10 }
 0x286   : > { %p5312_p1 = por %p5311_p11, %p5310_p4 }
 0x287   : > { %p5308_p2 = pneg %p5307_p13 }
 0x289   : > { %p5313_p3 = pnand %p5312_p1, %p5308_p2 }
 0x28b   : > { %5316 = shalt.err (!%p5313_p3)
}
 0x28c   : > { %4798 = dma.vmem_to_hbm [thread:$0]  (%p6153_p10), %s3882_s6, 32, %s3879_s15, %s3862_s26  }
 0x28d   : > { %s6154_s3 = sld [smem:[#allocation25_spill]]  ;;  %s3895_s5 = sshll.u32 %s5659_s8, 4  ;;  %s3896_s5 = int_to_ptr.vmem [resolvable:$true] %s3895_s5 }
 0x28e   : > { %s3867_s18 = scalar_lea.sflag [#allocation11], %s5654_s4  ;;  %s5317_s27 = scalar_lea.vmem %s3896_s5, 32 }
 0x28f   : > { %p5318_p12 = scmp.ne.s32.totalorder %s3896_s5, %s5317_s27  ;;  %s5457_s12 = smov [#allocation10]  }
 0x290   : > { %s5321_s22 = sshll.u32 %s5457_s12, 4  ;;  %s5322_s22 = int_to_ptr.vmem [resolvable:$false] %s5321_s22 }
 0x291   : > { %p5319_p6 = pnand %p5318_p12, %p6153_p10  ;;  %s5323_s7 = scalar_lea.vmem %s5322_s22, 64 }
 0x292   : > { %p5324_p8 = scmp.lt.s32.totalorder %s3896_s5, %s5322_s22  ;;  %p5325_p7 = scmp.lt.s32.totalorder %s5323_s7, %s5317_s27 }
 0x293   : > { %s3893_s23 = scalar_lea.hbm %s6154_s3, %s4386_s13  ;;  %p5320_p5 = pneg %p5319_p6 }
 0x294   : > { %p5326_p9 = por %p5325_p7, %p5324_p8 }
 0x296   : > { %p5327_p0 = pnand %p5326_p9, %p5320_p5 }
 0x298   : > { %5330 = shalt.err (!%p5327_p0)
}
 0x299   : > { %s5331_s21 = scalar_lea.hbm %s3893_s23, 32  ;;  %s5335_s13 = scalar_lea.hbm %s6154_s3, 64 }
 0x29a   : > { %p5332_p13 = scmp.ne.s32.totalorder %s3893_s23, %s5331_s21  ;;  %p5336_p11 = scmp.lt.s32.totalorder %s3893_s23, %s6154_s3 }
 0x29b   : > { %p5337_p1 = scmp.lt.s32.totalorder %s5335_s13, %s5331_s21 }
 0x29c   : > { %p5333_p2 = pnand %p5332_p13, %p6153_p10 }
 0x29d   : > { %p5338_p3 = por %p5337_p1, %p5336_p11 }
 0x29e   : > { %p5334_p4 = pneg %p5333_p2 }
 0x2a0   : > { %p5339_p12 = pnand %p5338_p3, %p5334_p4 }
 0x2a2   : > { %5342 = shalt.err (!%p5339_p12)
}
 0x2a3   : > { %4799 = dma.vmem_to_hbm [thread:$0]  (%p6153_p10), %s3896_s5, 32, %s3893_s23, %s3867_s18  }
 0x2a4 PF: > { %s6155_s26 = sld [smem:[#allocation16_spill]]  ;;  %p4825_p6 = scmp.ge.s32.totalorder %s5445_s25, 2 }
 0x2a5   : > { %s6156_s28 = sld [smem:[#allocation20_spill]] }
 0x2aa   : > { %s3907_s30 = sand.u32 1, %s6155_s26  }
 0x2ab   : > { %p6157_p5 = scmp.ne.s32.totalorder %s6156_s28, 0  ;;  %s3908_s29 = scalar_lea.sflag [#allocation5], %s3907_s30 }
 0x2ad   : > { %p4814_p8 = pnand %p4825_p6, %p6157_p5 }
 0x2af   : > { %p4815_p7 = pneg %p4814_p8 }
 0x2b1   : > { %5396 = dma.done.wait (%p4815_p7), %s3908_s29, 32  }
 0x2b2   : > { %5398 = vsyncadd (%p4815_p7), %s3908_s29, 4294967264  ;;  %s3917_s1 = scalar_lea.sflag [#allocation11], %s3907_s30 }
 0x2b3   : > { %5400 = dma.done.wait (%p4815_p7), %s3917_s1, 32  }
 0x2b4   : > { %5402 = vsyncadd (%p4815_p7), %s3917_s1, 4294967264  ;;  %s25_s25 = sadd.s32 1, %s5445_s25   ;;  %s6158_s21 = sld [smem:[#allocation18_spill]] }
 0x2b5   : > { %p22_p9 = scmp.ge.s32.totalorder %s25_s25, 8   ;;  %s6159_s23 = sld [smem:[#allocation21_spill]] }
 0x2b6   : > { %s6160_s15 = smov %s5409_s16  ;;  %s6161_s16 = smov %s5413_s17 }
 0x2b7   : > { %s6162_s17 = smov %s5620_s2  ;;  %s6163_s18 = smov %s5421_s19 }
 0x2b8   : > { %s6164_s19 = smov %s5425_s20  ;;  %s6165_s20 = smov %s5623_s9 }
 0x2b9   : > { %s6166_s22 = smov %s5441_s24  ;;  %s6167_s24 = smov %s6173_s14 }
 0x2ba   :  { %24 = sbr.rel (!%p22_p9) target bundleno = 17 (0x11), region = 113 }
 0x2bf   :  { %3922 = vsyncpa [#allocation4], 1 }
 0x2c0   :  { %3924 = vsyncpa [#allocation4 + $0x1], 1 }
 0x2c1   :  { %3925 = vsyncpa [#allocation7], 1 }
 0x2c2   :  { %3926 = vsyncpa [#allocation5], 1 }
 0x2c3   :  { %3928 = vsyncpa [#allocation5 + $0x1], 1 }
 0x2c4   :  { %3929 = vsyncpa [#allocation11], 1 }
 0x2c5   :  { %3931 = vsyncpa [#allocation11 + $0x1], 1 }

</bundles_post_ra>
